<compile_context>
chip_gen: v5e
topology: v5e:2x2
jax: 0.10.0
libtpu: 0.0.40
codegen_flags: <defaults>
</compile_context>

<pallas_src>
import functools

import jax
import jax.numpy as jnp
from jax.experimental import pallas as pl
from jax.experimental.pallas import tpu as pltpu


# ---------------------------------------------------------------------------
# Fused kernel: conv backbone (stand-in for R1DNet) + MocoClassifier head.
# One grid step == one batch element.
# ---------------------------------------------------------------------------
def _fused_forward_kernel(*refs, cfg, use_l2_norm):
    """refs layout (n = number of conv layers):

      [0]               x_ref   (Tpad0, Cin)   time-padded input, time x chan
      [1 .. 2n]         per layer: w_mat (Cin, K*Cout), bias (1, Cout)
      [2n+1], [2n+2]    fc_w (C_feat, num_class), fc_b (1, num_class)
      [2n+3]            o_ref (1, num_class)
      [2n+4 ..]         n-1 VMEM scratch buffers: padded input of layer i+1

    cfg: static per-layer tuple (ksize, stride, pad_next, t_pad, t_full, t_out, cout).
    """
    n = len(cfg)
    x_ref = refs[0]
    conv_refs = refs[1:1 + 2 * n]
    fcw_ref = refs[1 + 2 * n]
    fcb_ref = refs[2 + 2 * n]
    o_ref = refs[3 + 2 * n]
    bufs = refs[4 + 2 * n:]

    src = x_ref[...].astype(jnp.float32)            # (t_pad, cin)
    for i, (ksize, stride, pad_next, t_pad, t_full, t_out, cout) in enumerate(cfg):
        w = conv_refs[2 * i][...]                    # (cin, K*cout) lane-dense
        b = conv_refs[2 * i + 1][...]                # (1, cout)

        # All K taps in ONE MXU matmul: (t_pad, cin) @ (cin, K*cout).
        y = jnp.dot(src, w, preferred_element_type=jnp.float32)

        # Stride-1 conv output via shift-and-add of contiguous static slices.
        acc = y[0:t_full, 0:cout]
        for k in range(1, ksize):
            acc = acc + y[k:k + t_full, k * cout:(k + 1) * cout]

        # Stride decimation as one tiny selection matmul (no strided loads,
        # no gathers): sel[t, j] = 1 iff j == stride * t.
        if stride > 1:
            rows = jax.lax.broadcasted_iota(jnp.int32, (t_out, t_full), 0)
            cols = jax.lax.broadcasted_iota(jnp.int32, (t_out, t_full), 1)
            sel = (cols == stride * rows).astype(jnp.float32)
            acc = jnp.dot(sel, acc, preferred_element_type=jnp.float32)

        act = jnp.maximum(acc + b, 0.0)              # bias + ReLU, (t_out, cout)

        if i < n - 1:
            # Hand the next layer a time-padded copy: zero only the pad edges,
            # write the interior once (all static contiguous slices).
            buf = bufs[i]                            # (t_out + 2*pad_next, cout)
            if pad_next > 0:
                edge = jnp.zeros((pad_next, cout), jnp.float32)
                buf[0:pad_next, :] = edge
                buf[pad_next + t_out:pad_next + t_out + pad_next, :] = edge
            buf[pad_next:pad_next + t_out, :] = act
            src = buf[...]
        else:
            src = act

    # ---- classifier head ---------------------------------------------------
    # adaptive_avg_pool1d(., 1) -> flatten -> Dropout (eval = identity) -> Linear
    pooled = jnp.mean(src, axis=0, keepdims=True)    # (1, C_feat)
    if use_l2_norm:                                  # F.normalize(p=2, dim=1)
        norm = jnp.sqrt(jnp.sum(pooled * pooled, axis=-1, keepdims=True))
        pooled = pooled / jnp.maximum(norm, 1e-12)
    # TODO(synk): use_final_bn (nn.BatchNorm1d) and training-mode Dropout are
    # not implemented; module defaults are use_final_bn=False and eval Dropout.
    logits = jnp.dot(pooled, fcw_ref[...], preferred_element_type=jnp.float32)
    o_ref[...] = (logits + fcb_ref[...]).astype(o_ref.dtype)


# ---------------------------------------------------------------------------
# Wrapper: one pallas_call for the whole forward, grid over batch.
# ---------------------------------------------------------------------------
@functools.partial(jax.jit, static_argnames=("config", "use_l2_norm"))
def moco_classifier_forward(params, x, config, use_l2_norm=False):
    """x: (B, in_channel, L) float32, NCL layout matching PyTorch Conv1d."""
    conv_cfg, num_class = config        # conv_cfg: ((kernel, stride, pad), ...)
    B, cin, L = x.shape
    n = len(conv_cfg)

    # Static per-layer planning (output lengths, scratch shapes).
    cfg = []
    scratch = []
    t_in = L
    for i, (ksize, stride, pad) in enumerate(conv_cfg):
        cout = params["convs"][i]["b"].shape[1]
        t_pad = t_in + 2 * pad
        t_full = t_pad - ksize + 1                   # stride-1 output length
        t_out = (t_pad - ksize) // stride + 1        # strided output length
        pad_next = conv_cfg[i + 1][2] if i + 1 < n else 0
        cfg.append((ksize, stride, pad_next, t_pad, t_full, t_out, cout))
        if i < n - 1:
            scratch.append(pltpu.VMEM((t_out + 2 * pad_next, cout), jnp.float32))
        t_in = t_out

    # (B, C, L) -> (B, Tpad0, C): time on sublanes, channels on lanes, with the
    # first conv's zero padding folded in (single tiny XLA op).
    pad0 = conv_cfg[0][2]
    x_tc = jnp.pad(jnp.transpose(x, (0, 2, 1)).astype(jnp.float32),
                   ((0, 0), (pad0, pad0), (0, 0)))
    t_pad0 = L + 2 * pad0

    inputs = [x_tc]
    for layer in params["convs"]:
        inputs.append(layer["w_mat"])
        inputs.append(layer["b"])
    inputs.append(params["fc_w"])
    inputs.append(params["fc_b"])

    def _resident(a):                    # full array, same block every grid step
        r = a.ndim
        return pl.BlockSpec(a.shape, lambda b, _r=r: (0,) * _r)

    in_specs = [pl.BlockSpec((None, t_pad0, cin), lambda b: (b, 0, 0))]
    in_specs += [_resident(a) for a in inputs[1:]]
    out_specs = pl.BlockSpec((None, 1, num_class), lambda b: (b, 0, 0))

    kernel = functools.partial(_fused_forward_kernel, cfg=tuple(cfg),
                               use_l2_norm=use_l2_norm)
    out = pl.pallas_call(
        kernel,
        out_shape=jax.ShapeDtypeStruct((B, 1, num_class), jnp.float32),
        grid=(B,),
        in_specs=in_specs,
        out_specs=out_specs,
        scratch_shapes=scratch,
        compiler_params=pltpu.CompilerParams(
            dimension_semantics=("parallel",)),      # v7x: one sample per core
    )(*inputs)
    return out.reshape(B, num_class)


# ---------------------------------------------------------------------------
# Deterministic parameter construction (kernel-friendly layout)
# ---------------------------------------------------------------------------
def init_params(key, in_channel=2, mid_channel=8, num_class=5):
    """TODO(synk): the R1DNet backbone source is not part of the provided
    module; a deterministic stand-in 1-D conv stack (in->mid->2mid->4mid->8mid,
    kernel sizes [7,11,11,7], stride 2, ReLU) is used in its place.  The
    classifier head matches MocoClassifier exactly (final_fc weight ~ N(0,
    0.01), bias = 0, eval-mode Dropout)."""
    kernel_sizes = (7, 11, 11, 7)
    channels = (in_channel, mid_channel, mid_channel * 2,
                mid_channel * 4, mid_channel * 8)
    feature_size = channels[-1]

    keys = jax.random.split(key, len(kernel_sizes) + 1)
    convs = []
    conv_cfg = []
    for li, (k, cin, cout) in enumerate(zip(kernel_sizes, channels[:-1],
                                            channels[1:])):
        scale = 1.0 / jnp.sqrt(float(cin * k))
        w = scale * jax.random.normal(keys[li], (cout, cin, k), dtype=jnp.float32)
        # Lane-dense kernel layout: (Cout, Cin, K) -> (Cin, K*Cout); tap k lives
        # in columns [k*Cout, (k+1)*Cout).
        w_mat = jnp.transpose(w, (1, 2, 0)).reshape(cin, k * cout)
        convs.append({"w_mat": w_mat,
                      "b": jnp.zeros((1, cout), dtype=jnp.float32)})
        conv_cfg.append((k, 2, k // 2))              # (kernel, stride, padding)

    # MocoClassifier._initialize_weights(final_fc): weight ~ N(0, 0.01), bias 0.
    fc_w = 0.01 * jax.random.normal(keys[-1], (feature_size, num_class),
                                    dtype=jnp.float32)
    fc_b = jnp.zeros((1, num_class), dtype=jnp.float32)

    params = {"convs": convs, "fc_w": fc_w, "fc_b": fc_b}
    config = (tuple(conv_cfg), num_class)
    return params, config


if __name__ == "__main__":
    key = jax.random.PRNGKey(0)
    k_param, k_data = jax.random.split(key)

    B, in_channel, L = 2, 2, 128
    mid_channel, num_class = 8, 5

    params, config = init_params(k_param, in_channel=in_channel,
                                 mid_channel=mid_channel, num_class=num_class)
    x = jax.random.normal(k_data, (B, in_channel, L), dtype=jnp.float32)

    logits = moco_classifier_forward(params, x, config)
    logits = jax.block_until_ready(logits)

    assert logits.shape == (B, num_class), logits.shape
    assert logits.dtype == jnp.float32
    assert bool(jnp.all(jnp.isfinite(logits)))
    print("KERNEL_OK")
</pallas_src>

<mosaic_0001>
module attributes {stable_mosaic.version = 11 : i64} {
  func.func @_fused_forward_kernel(%arg0: i32, %arg1: memref<1x134x2xf32, #tpu.memory_space<vmem>>, %arg2: memref<2x56xf32, #tpu.memory_space<vmem>>, %arg3: memref<1x8xf32, #tpu.memory_space<vmem>>, %arg4: memref<8x176xf32, #tpu.memory_space<vmem>>, %arg5: memref<1x16xf32, #tpu.memory_space<vmem>>, %arg6: memref<16x352xf32, #tpu.memory_space<vmem>>, %arg7: memref<1x32xf32, #tpu.memory_space<vmem>>, %arg8: memref<32x448xf32, #tpu.memory_space<vmem>>, %arg9: memref<1x64xf32, #tpu.memory_space<vmem>>, %arg10: memref<64x5xf32, #tpu.memory_space<vmem>>, %arg11: memref<1x5xf32, #tpu.memory_space<vmem>>, %arg12: memref<1x1x5xf32, #tpu.memory_space<vmem>>, %arg13: memref<74x8xf32, #tpu.memory_space<vmem>>, %arg14: memref<42x16xf32, #tpu.memory_space<vmem>>, %arg15: memref<22x32xf32, #tpu.memory_space<vmem>>) attributes {dimension_semantics = [#tpu.dimension_semantics<parallel>], iteration_bounds = array<i64: 2>, scalar_prefetch = 0 : i64, scratch_operands = 3 : i64, tpu.core_type = #tpu.core_type<tc>, window_params = [{transform_indices = @transform_0, window_bounds = array<i64: 1, 134, 2>}, {pipeline_mode = #tpu.pipeline_mode<synchronous>, transform_indices = @transform_1, window_bounds = array<i64: 2, 56>}, {pipeline_mode = #tpu.pipeline_mode<synchronous>, transform_indices = @transform_2, window_bounds = array<i64: 1, 8>}, {pipeline_mode = #tpu.pipeline_mode<synchronous>, transform_indices = @transform_3, window_bounds = array<i64: 8, 176>}, {pipeline_mode = #tpu.pipeline_mode<synchronous>, transform_indices = @transform_4, window_bounds = array<i64: 1, 16>}, {pipeline_mode = #tpu.pipeline_mode<synchronous>, transform_indices = @transform_5, window_bounds = array<i64: 16, 352>}, {pipeline_mode = #tpu.pipeline_mode<synchronous>, transform_indices = @transform_6, window_bounds = array<i64: 1, 32>}, {pipeline_mode = #tpu.pipeline_mode<synchronous>, transform_indices = @transform_7, window_bounds = array<i64: 32, 448>}, {pipeline_mode = #tpu.pipeline_mode<synchronous>, transform_indices = @transform_8, window_bounds = array<i64: 1, 64>}, {pipeline_mode = #tpu.pipeline_mode<synchronous>, transform_indices = @transform_9, window_bounds = array<i64: 64, 5>}, {pipeline_mode = #tpu.pipeline_mode<synchronous>, transform_indices = @transform_10, window_bounds = array<i64: 1, 5>}, {transform_indices = @transform_11, window_bounds = array<i64: 1, 1, 5>}]} {
    %c0 = arith.constant 0 : index
    %c0_0 = arith.constant 0 : index
    %c0_1 = arith.constant 0 : index
    %0 = vector.load %arg1[%c0, %c0_0, %c0_1] : memref<1x134x2xf32, #tpu.memory_space<vmem>>, vector<1x134x2xf32>
    %1 = vector.shape_cast %0 : vector<1x134x2xf32> to vector<134x2xf32>
    %c0_2 = arith.constant 0 : index
    %c0_3 = arith.constant 0 : index
    %2 = vector.load %arg2[%c0_2, %c0_3] : memref<2x56xf32, #tpu.memory_space<vmem>>, vector<2x56xf32>
    %c0_4 = arith.constant 0 : index
    %c0_5 = arith.constant 0 : index
    %3 = vector.load %arg3[%c0_4, %c0_5] : memref<1x8xf32, #tpu.memory_space<vmem>>, vector<1x8xf32>
    %cst = arith.constant dense<0.000000e+00> : vector<134x56xf32>
    %4 = tpu.matmul %1, %2, %cst {dimension_numbers = #tpu.dot_dimension_numbers<[1], [0], [0], [1], [0, 0, 1, 1], [], []>} : vector<134x2xf32>, vector<2x56xf32>, vector<134x56xf32> -> vector<134x56xf32>
    %5 = vector.extract_strided_slice %4 {offsets = [0, 0], sizes = [128, 8], strides = [1, 1]} : vector<134x56xf32> to vector<128x8xf32>
    %6 = vector.extract_strided_slice %4 {offsets = [1, 8], sizes = [128, 8], strides = [1, 1]} : vector<134x56xf32> to vector<128x8xf32>
    %7 = arith.addf %5, %6 : vector<128x8xf32>
    %8 = vector.extract_strided_slice %4 {offsets = [2, 16], sizes = [128, 8], strides = [1, 1]} : vector<134x56xf32> to vector<128x8xf32>
    %9 = arith.addf %7, %8 : vector<128x8xf32>
    %10 = vector.extract_strided_slice %4 {offsets = [3, 24], sizes = [128, 8], strides = [1, 1]} : vector<134x56xf32> to vector<128x8xf32>
    %11 = arith.addf %9, %10 : vector<128x8xf32>
    %12 = vector.extract_strided_slice %4 {offsets = [4, 32], sizes = [128, 8], strides = [1, 1]} : vector<134x56xf32> to vector<128x8xf32>
    %13 = arith.addf %11, %12 : vector<128x8xf32>
    %14 = vector.extract_strided_slice %4 {offsets = [5, 40], sizes = [128, 8], strides = [1, 1]} : vector<134x56xf32> to vector<128x8xf32>
    %15 = arith.addf %13, %14 : vector<128x8xf32>
    %16 = vector.extract_strided_slice %4 {offsets = [6, 48], sizes = [128, 8], strides = [1, 1]} : vector<134x56xf32> to vector<128x8xf32>
    %17 = arith.addf %15, %16 : vector<128x8xf32>
    %18 = tpu.iota {dimensions = array<i32: 0>} : vector<64x128xi32>
    %19 = tpu.iota {dimensions = array<i32: 1>} : vector<64x128xi32>
    %c2_i32 = arith.constant 2 : i32
    %20 = vector.broadcast %c2_i32 : i32 to vector<64x128xi32>
    %21 = arith.muli %20, %18 : vector<64x128xi32>
    %22 = arith.cmpi eq, %19, %21 : vector<64x128xi32>
    %23 = arith.extui %22 : vector<64x128xi1> to vector<64x128xi32>
    %24 = arith.sitofp %23 : vector<64x128xi32> to vector<64x128xf32>
    %cst_6 = arith.constant dense<0.000000e+00> : vector<64x8xf32>
    %25 = tpu.matmul %24, %17, %cst_6 {dimension_numbers = #tpu.dot_dimension_numbers<[1], [0], [0], [1], [0, 0, 1, 1], [], []>} : vector<64x128xf32>, vector<128x8xf32>, vector<64x8xf32> -> vector<64x8xf32>
    %26 = vector.broadcast %3 : vector<1x8xf32> to vector<64x8xf32>
    %27 = arith.addf %25, %26 : vector<64x8xf32>
    %cst_7 = arith.constant 0.000000e+00 : f32
    %28 = vector.broadcast %cst_7 : f32 to vector<64x8xf32>
    %29 = arith.maximumf %27, %28 : vector<64x8xf32>
    %cst_8 = arith.constant 0.000000e+00 : f32
    %30 = vector.broadcast %cst_8 : f32 to vector<5x8xf32>
    %c0_9 = arith.constant 0 : index
    %c0_10 = arith.constant 0 : index
    %31 = vector.load %arg13[%c0_9, %c0_10] : memref<74x8xf32, #tpu.memory_space<vmem>>, vector<5x8xf32>
    tpu.vector_store %arg13[%c0_9, %c0_10], %30 {strides = array<i32>} : memref<74x8xf32, #tpu.memory_space<vmem>>, vector<5x8xf32>,
    %c69 = arith.constant 69 : index
    %c0_11 = arith.constant 0 : index
    %32 = vector.load %arg13[%c69, %c0_11] : memref<74x8xf32, #tpu.memory_space<vmem>>, vector<5x8xf32>
    tpu.vector_store %arg13[%c69, %c0_11], %30 {strides = array<i32>} : memref<74x8xf32, #tpu.memory_space<vmem>>, vector<5x8xf32>,
    %c5 = arith.constant 5 : index
    %c0_12 = arith.constant 0 : index
    %33 = vector.load %arg13[%c5, %c0_12] : memref<74x8xf32, #tpu.memory_space<vmem>>, vector<64x8xf32>
    tpu.vector_store %arg13[%c5, %c0_12], %29 {strides = array<i32>} : memref<74x8xf32, #tpu.memory_space<vmem>>, vector<64x8xf32>,
    %c0_13 = arith.constant 0 : index
    %c0_14 = arith.constant 0 : index
    %34 = vector.load %arg13[%c0_13, %c0_14] : memref<74x8xf32, #tpu.memory_space<vmem>>, vector<74x8xf32>
    %c0_15 = arith.constant 0 : index
    %c0_16 = arith.constant 0 : index
    %35 = vector.load %arg4[%c0_15, %c0_16] : memref<8x176xf32, #tpu.memory_space<vmem>>, vector<8x176xf32>
    %c0_17 = arith.constant 0 : index
    %c0_18 = arith.constant 0 : index
    %36 = vector.load %arg5[%c0_17, %c0_18] : memref<1x16xf32, #tpu.memory_space<vmem>>, vector<1x16xf32>
    %cst_19 = arith.constant dense<0.000000e+00> : vector<74x176xf32>
    %37 = tpu.matmul %34, %35, %cst_19 {dimension_numbers = #tpu.dot_dimension_numbers<[1], [0], [0], [1], [0, 0, 1, 1], [], []>} : vector<74x8xf32>, vector<8x176xf32>, vector<74x176xf32> -> vector<74x176xf32>
    %38 = vector.extract_strided_slice %37 {offsets = [0, 0], sizes = [64, 16], strides = [1, 1]} : vector<74x176xf32> to vector<64x16xf32>
    %39 = vector.extract_strided_slice %37 {offsets = [1, 16], sizes = [64, 16], strides = [1, 1]} : vector<74x176xf32> to vector<64x16xf32>
    %40 = arith.addf %38, %39 : vector<64x16xf32>
    %41 = vector.extract_strided_slice %37 {offsets = [2, 32], sizes = [64, 16], strides = [1, 1]} : vector<74x176xf32> to vector<64x16xf32>
    %42 = arith.addf %40, %41 : vector<64x16xf32>
    %43 = vector.extract_strided_slice %37 {offsets = [3, 48], sizes = [64, 16], strides = [1, 1]} : vector<74x176xf32> to vector<64x16xf32>
    %44 = arith.addf %42, %43 : vector<64x16xf32>
    %45 = vector.extract_strided_slice %37 {offsets = [4, 64], sizes = [64, 16], strides = [1, 1]} : vector<74x176xf32> to vector<64x16xf32>
    %46 = arith.addf %44, %45 : vector<64x16xf32>
    %47 = vector.extract_strided_slice %37 {offsets = [5, 80], sizes = [64, 16], strides = [1, 1]} : vector<74x176xf32> to vector<64x16xf32>
    %48 = arith.addf %46, %47 : vector<64x16xf32>
    %49 = vector.extract_strided_slice %37 {offsets = [6, 96], sizes = [64, 16], strides = [1, 1]} : vector<74x176xf32> to vector<64x16xf32>
    %50 = arith.addf %48, %49 : vector<64x16xf32>
    %51 = vector.extract_strided_slice %37 {offsets = [7, 112], sizes = [64, 16], strides = [1, 1]} : vector<74x176xf32> to vector<64x16xf32>
    %52 = arith.addf %50, %51 : vector<64x16xf32>
    %53 = vector.extract_strided_slice %37 {offsets = [8, 128], sizes = [64, 16], strides = [1, 1]} : vector<74x176xf32> to vector<64x16xf32>
    %54 = arith.addf %52, %53 : vector<64x16xf32>
    %55 = vector.extract_strided_slice %37 {offsets = [9, 144], sizes = [64, 16], strides = [1, 1]} : vector<74x176xf32> to vector<64x16xf32>
    %56 = arith.addf %54, %55 : vector<64x16xf32>
    %57 = vector.extract_strided_slice %37 {offsets = [10, 160], sizes = [64, 16], strides = [1, 1]} : vector<74x176xf32> to vector<64x16xf32>
    %58 = arith.addf %56, %57 : vector<64x16xf32>
    %59 = tpu.iota {dimensions = array<i32: 0>} : vector<32x64xi32>
    %60 = tpu.iota {dimensions = array<i32: 1>} : vector<32x64xi32>
    %c2_i32_20 = arith.constant 2 : i32
    %61 = vector.broadcast %c2_i32_20 : i32 to vector<32x64xi32>
    %62 = arith.muli %61, %59 : vector<32x64xi32>
    %63 = arith.cmpi eq, %60, %62 : vector<32x64xi32>
    %64 = arith.extui %63 : vector<32x64xi1> to vector<32x64xi32>
    %65 = arith.sitofp %64 : vector<32x64xi32> to vector<32x64xf32>
    %cst_21 = arith.constant dense<0.000000e+00> : vector<32x16xf32>
    %66 = tpu.matmul %65, %58, %cst_21 {dimension_numbers = #tpu.dot_dimension_numbers<[1], [0], [0], [1], [0, 0, 1, 1], [], []>} : vector<32x64xf32>, vector<64x16xf32>, vector<32x16xf32> -> vector<32x16xf32>
    %67 = vector.broadcast %36 : vector<1x16xf32> to vector<32x16xf32>
    %68 = arith.addf %66, %67 : vector<32x16xf32>
    %cst_22 = arith.constant 0.000000e+00 : f32
    %69 = vector.broadcast %cst_22 : f32 to vector<32x16xf32>
    %70 = arith.maximumf %68, %69 : vector<32x16xf32>
    %cst_23 = arith.constant 0.000000e+00 : f32
    %71 = vector.broadcast %cst_23 : f32 to vector<5x16xf32>
    %c0_24 = arith.constant 0 : index
    %c0_25 = arith.constant 0 : index
    %72 = vector.load %arg14[%c0_24, %c0_25] : memref<42x16xf32, #tpu.memory_space<vmem>>, vector<5x16xf32>
    tpu.vector_store %arg14[%c0_24, %c0_25], %71 {strides = array<i32>} : memref<42x16xf32, #tpu.memory_space<vmem>>, vector<5x16xf32>,
    %c37 = arith.constant 37 : index
    %c0_26 = arith.constant 0 : index
    %73 = vector.load %arg14[%c37, %c0_26] : memref<42x16xf32, #tpu.memory_space<vmem>>, vector<5x16xf32>
    tpu.vector_store %arg14[%c37, %c0_26], %71 {strides = array<i32>} : memref<42x16xf32, #tpu.memory_space<vmem>>, vector<5x16xf32>,
    %c5_27 = arith.constant 5 : index
    %c0_28 = arith.constant 0 : index
    %74 = vector.load %arg14[%c5_27, %c0_28] : memref<42x16xf32, #tpu.memory_space<vmem>>, vector<32x16xf32>
    tpu.vector_store %arg14[%c5_27, %c0_28], %70 {strides = array<i32>} : memref<42x16xf32, #tpu.memory_space<vmem>>, vector<32x16xf32>,
    %c0_29 = arith.constant 0 : index
    %c0_30 = arith.constant 0 : index
    %75 = vector.load %arg14[%c0_29, %c0_30] : memref<42x16xf32, #tpu.memory_space<vmem>>, vector<42x16xf32>
    %c0_31 = arith.constant 0 : index
    %c0_32 = arith.constant 0 : index
    %76 = vector.load %arg6[%c0_31, %c0_32] : memref<16x352xf32, #tpu.memory_space<vmem>>, vector<16x352xf32>
    %c0_33 = arith.constant 0 : index
    %c0_34 = arith.constant 0 : index
    %77 = vector.load %arg7[%c0_33, %c0_34] : memref<1x32xf32, #tpu.memory_space<vmem>>, vector<1x32xf32>
    %cst_35 = arith.constant dense<0.000000e+00> : vector<42x352xf32>
    %78 = tpu.matmul %75, %76, %cst_35 {dimension_numbers = #tpu.dot_dimension_numbers<[1], [0], [0], [1], [0, 0, 1, 1], [], []>} : vector<42x16xf32>, vector<16x352xf32>, vector<42x352xf32> -> vector<42x352xf32>
    %79 = vector.extract_strided_slice %78 {offsets = [0, 0], sizes = [32, 32], strides = [1, 1]} : vector<42x352xf32> to vector<32x32xf32>
    %80 = vector.extract_strided_slice %78 {offsets = [1, 32], sizes = [32, 32], strides = [1, 1]} : vector<42x352xf32> to vector<32x32xf32>
    %81 = arith.addf %79, %80 : vector<32x32xf32>
    %82 = vector.extract_strided_slice %78 {offsets = [2, 64], sizes = [32, 32], strides = [1, 1]} : vector<42x352xf32> to vector<32x32xf32>
    %83 = arith.addf %81, %82 : vector<32x32xf32>
    %84 = vector.extract_strided_slice %78 {offsets = [3, 96], sizes = [32, 32], strides = [1, 1]} : vector<42x352xf32> to vector<32x32xf32>
    %85 = arith.addf %83, %84 : vector<32x32xf32>
    %86 = vector.extract_strided_slice %78 {offsets = [4, 128], sizes = [32, 32], strides = [1, 1]} : vector<42x352xf32> to vector<32x32xf32>
    %87 = arith.addf %85, %86 : vector<32x32xf32>
    %88 = vector.extract_strided_slice %78 {offsets = [5, 160], sizes = [32, 32], strides = [1, 1]} : vector<42x352xf32> to vector<32x32xf32>
    %89 = arith.addf %87, %88 : vector<32x32xf32>
    %90 = vector.extract_strided_slice %78 {offsets = [6, 192], sizes = [32, 32], strides = [1, 1]} : vector<42x352xf32> to vector<32x32xf32>
    %91 = arith.addf %89, %90 : vector<32x32xf32>
    %92 = vector.extract_strided_slice %78 {offsets = [7, 224], sizes = [32, 32], strides = [1, 1]} : vector<42x352xf32> to vector<32x32xf32>
    %93 = arith.addf %91, %92 : vector<32x32xf32>
    %94 = vector.extract_strided_slice %78 {offsets = [8, 256], sizes = [32, 32], strides = [1, 1]} : vector<42x352xf32> to vector<32x32xf32>
    %95 = arith.addf %93, %94 : vector<32x32xf32>
    %96 = vector.extract_strided_slice %78 {offsets = [9, 288], sizes = [32, 32], strides = [1, 1]} : vector<42x352xf32> to vector<32x32xf32>
    %97 = arith.addf %95, %96 : vector<32x32xf32>
    %98 = vector.extract_strided_slice %78 {offsets = [10, 320], sizes = [32, 32], strides = [1, 1]} : vector<42x352xf32> to vector<32x32xf32>
    %99 = arith.addf %97, %98 : vector<32x32xf32>
    %100 = tpu.iota {dimensions = array<i32: 0>} : vector<16x32xi32>
    %101 = tpu.iota {dimensions = array<i32: 1>} : vector<16x32xi32>
    %c2_i32_36 = arith.constant 2 : i32
    %102 = vector.broadcast %c2_i32_36 : i32 to vector<16x32xi32>
    %103 = arith.muli %102, %100 : vector<16x32xi32>
    %104 = arith.cmpi eq, %101, %103 : vector<16x32xi32>
    %105 = arith.extui %104 : vector<16x32xi1> to vector<16x32xi32>
    %106 = arith.sitofp %105 : vector<16x32xi32> to vector<16x32xf32>
    %cst_37 = arith.constant dense<0.000000e+00> : vector<16x32xf32>
    %107 = tpu.matmul %106, %99, %cst_37 {dimension_numbers = #tpu.dot_dimension_numbers<[1], [0], [0], [1], [0, 0, 1, 1], [], []>} : vector<16x32xf32>, vector<32x32xf32>, vector<16x32xf32> -> vector<16x32xf32>
    %108 = vector.broadcast %77 : vector<1x32xf32> to vector<16x32xf32>
    %109 = arith.addf %107, %108 : vector<16x32xf32>
    %cst_38 = arith.constant 0.000000e+00 : f32
    %110 = vector.broadcast %cst_38 : f32 to vector<16x32xf32>
    %111 = arith.maximumf %109, %110 : vector<16x32xf32>
    %cst_39 = arith.constant 0.000000e+00 : f32
    %112 = vector.broadcast %cst_39 : f32 to vector<3x32xf32>
    %c0_40 = arith.constant 0 : index
    %c0_41 = arith.constant 0 : index
    %113 = vector.load %arg15[%c0_40, %c0_41] : memref<22x32xf32, #tpu.memory_space<vmem>>, vector<3x32xf32>
    tpu.vector_store %arg15[%c0_40, %c0_41], %112 {strides = array<i32>} : memref<22x32xf32, #tpu.memory_space<vmem>>, vector<3x32xf32>,
    %c19 = arith.constant 19 : index
    %c0_42 = arith.constant 0 : index
    %114 = vector.load %arg15[%c19, %c0_42] : memref<22x32xf32, #tpu.memory_space<vmem>>, vector<3x32xf32>
    tpu.vector_store %arg15[%c19, %c0_42], %112 {strides = array<i32>} : memref<22x32xf32, #tpu.memory_space<vmem>>, vector<3x32xf32>,
    %c3 = arith.constant 3 : index
    %c0_43 = arith.constant 0 : index
    %115 = vector.load %arg15[%c3, %c0_43] : memref<22x32xf32, #tpu.memory_space<vmem>>, vector<16x32xf32>
    tpu.vector_store %arg15[%c3, %c0_43], %111 {strides = array<i32>} : memref<22x32xf32, #tpu.memory_space<vmem>>, vector<16x32xf32>,
    %c0_44 = arith.constant 0 : index
    %c0_45 = arith.constant 0 : index
    %116 = vector.load %arg15[%c0_44, %c0_45] : memref<22x32xf32, #tpu.memory_space<vmem>>, vector<22x32xf32>
    %c0_46 = arith.constant 0 : index
    %c0_47 = arith.constant 0 : index
    %117 = vector.load %arg8[%c0_46, %c0_47] : memref<32x448xf32, #tpu.memory_space<vmem>>, vector<32x448xf32>
    %c0_48 = arith.constant 0 : index
    %c0_49 = arith.constant 0 : index
    %118 = vector.load %arg9[%c0_48, %c0_49] : memref<1x64xf32, #tpu.memory_space<vmem>>, vector<1x64xf32>
    %cst_50 = arith.constant dense<0.000000e+00> : vector<22x448xf32>
    %119 = tpu.matmul %116, %117, %cst_50 {dimension_numbers = #tpu.dot_dimension_numbers<[1], [0], [0], [1], [0, 0, 1, 1], [], []>} : vector<22x32xf32>, vector<32x448xf32>, vector<22x448xf32> -> vector<22x448xf32>
    %120 = vector.extract_strided_slice %119 {offsets = [0, 0], sizes = [16, 64], strides = [1, 1]} : vector<22x448xf32> to vector<16x64xf32>
    %121 = vector.extract_strided_slice %119 {offsets = [1, 64], sizes = [16, 64], strides = [1, 1]} : vector<22x448xf32> to vector<16x64xf32>
    %122 = arith.addf %120, %121 : vector<16x64xf32>
    %123 = vector.extract_strided_slice %119 {offsets = [2, 128], sizes = [16, 64], strides = [1, 1]} : vector<22x448xf32> to vector<16x64xf32>
    %124 = arith.addf %122, %123 : vector<16x64xf32>
    %125 = vector.extract_strided_slice %119 {offsets = [3, 192], sizes = [16, 64], strides = [1, 1]} : vector<22x448xf32> to vector<16x64xf32>
    %126 = arith.addf %124, %125 : vector<16x64xf32>
    %127 = vector.extract_strided_slice %119 {offsets = [4, 256], sizes = [16, 64], strides = [1, 1]} : vector<22x448xf32> to vector<16x64xf32>
    %128 = arith.addf %126, %127 : vector<16x64xf32>
    %129 = vector.extract_strided_slice %119 {offsets = [5, 320], sizes = [16, 64], strides = [1, 1]} : vector<22x448xf32> to vector<16x64xf32>
    %130 = arith.addf %128, %129 : vector<16x64xf32>
    %131 = vector.extract_strided_slice %119 {offsets = [6, 384], sizes = [16, 64], strides = [1, 1]} : vector<22x448xf32> to vector<16x64xf32>
    %132 = arith.addf %130, %131 : vector<16x64xf32>
    %133 = tpu.iota {dimensions = array<i32: 0>} : vector<8x16xi32>
    %134 = tpu.iota {dimensions = array<i32: 1>} : vector<8x16xi32>
    %c2_i32_51 = arith.constant 2 : i32
    %135 = vector.broadcast %c2_i32_51 : i32 to vector<8x16xi32>
    %136 = arith.muli %135, %133 : vector<8x16xi32>
    %137 = arith.cmpi eq, %134, %136 : vector<8x16xi32>
    %138 = arith.extui %137 : vector<8x16xi1> to vector<8x16xi32>
    %139 = arith.sitofp %138 : vector<8x16xi32> to vector<8x16xf32>
    %cst_52 = arith.constant dense<0.000000e+00> : vector<8x64xf32>
    %140 = tpu.matmul %139, %132, %cst_52 {dimension_numbers = #tpu.dot_dimension_numbers<[1], [0], [0], [1], [0, 0, 1, 1], [], []>} : vector<8x16xf32>, vector<16x64xf32>, vector<8x64xf32> -> vector<8x64xf32>
    %141 = vector.broadcast %118 : vector<1x64xf32> to vector<8x64xf32>
    %142 = arith.addf %140, %141 : vector<8x64xf32>
    %cst_53 = arith.constant 0.000000e+00 : f32
    %143 = vector.broadcast %cst_53 : f32 to vector<8x64xf32>
    %144 = arith.maximumf %142, %143 : vector<8x64xf32>
    %cst_54 = arith.constant dense<0.000000e+00> : vector<64xf32>
    %145 = vector.multi_reduction <add>, %144, %cst_54 [0] : vector<8x64xf32> to vector<64xf32>
    %146 = vector.shape_cast %145 : vector<64xf32> to vector<1x64xf32>
    %cst_55 = arith.constant 8.000000e+00 : f32
    %147 = vector.broadcast %cst_55 : f32 to vector<1x64xf32>
    %148 = arith.divf %146, %147 : vector<1x64xf32>
    %c0_56 = arith.constant 0 : index
    %c0_57 = arith.constant 0 : index
    %149 = vector.load %arg10[%c0_56, %c0_57] : memref<64x5xf32, #tpu.memory_space<vmem>>, vector<64x5xf32>
    %cst_58 = arith.constant dense<0.000000e+00> : vector<1x5xf32>
    %150 = tpu.matmul %148, %149, %cst_58 {dimension_numbers = #tpu.dot_dimension_numbers<[1], [0], [0], [1], [0, 0, 1, 1], [], []>} : vector<1x64xf32>, vector<64x5xf32>, vector<1x5xf32> -> vector<1x5xf32>
    %c0_59 = arith.constant 0 : index
    %c0_60 = arith.constant 0 : index
    %151 = vector.load %arg11[%c0_59, %c0_60] : memref<1x5xf32, #tpu.memory_space<vmem>>, vector<1x5xf32>
    %152 = arith.addf %150, %151 : vector<1x5xf32>
    %c0_61 = arith.constant 0 : index
    %c0_62 = arith.constant 0 : index
    %c0_63 = arith.constant 0 : index
    %153 = vector.load %arg12[%c0_61, %c0_62, %c0_63] : memref<1x1x5xf32, #tpu.memory_space<vmem>>, vector<1x1x5xf32>
    %154 = vector.shape_cast %153 : vector<1x1x5xf32> to vector<1x5xf32>
    %155 = vector.shape_cast %152 : vector<1x5xf32> to vector<1x1x5xf32>
    tpu.vector_store %arg12[%c0_61, %c0_62, %c0_63], %155 {strides = array<i32>} : memref<1x1x5xf32, #tpu.memory_space<vmem>>, vector<1x1x5xf32>,
    return
  }
  func.func @transform_0(%arg0: i32) -> (i32, i32, i32) {
    %c0_i32 = arith.constant 0 : i32
    %c0_i32_0 = arith.constant 0 : i32
    %c0_i32_1 = arith.constant 0 : i32
    return %arg0, %c0_i32, %c0_i32_0 : i32, i32, i32
  }
  func.func @transform_1(%arg0: i32) -> (i32, i32) {
    %c0_i32 = arith.constant 0 : i32
    %c0_i32_0 = arith.constant 0 : i32
    %c0_i32_1 = arith.constant 0 : i32
    return %c0_i32, %c0_i32_0 : i32, i32
  }
  func.func @transform_2(%arg0: i32) -> (i32, i32) {
    %c0_i32 = arith.constant 0 : i32
    %c0_i32_0 = arith.constant 0 : i32
    %c0_i32_1 = arith.constant 0 : i32
    return %c0_i32, %c0_i32_0 : i32, i32
  }
  func.func @transform_3(%arg0: i32) -> (i32, i32) {
    %c0_i32 = arith.constant 0 : i32
    %c0_i32_0 = arith.constant 0 : i32
    %c0_i32_1 = arith.constant 0 : i32
    return %c0_i32, %c0_i32_0 : i32, i32
  }
  func.func @transform_4(%arg0: i32) -> (i32, i32) {
    %c0_i32 = arith.constant 0 : i32
    %c0_i32_0 = arith.constant 0 : i32
    %c0_i32_1 = arith.constant 0 : i32
    return %c0_i32, %c0_i32_0 : i32, i32
  }
  func.func @transform_5(%arg0: i32) -> (i32, i32) {
    %c0_i32 = arith.constant 0 : i32
    %c0_i32_0 = arith.constant 0 : i32
    %c0_i32_1 = arith.constant 0 : i32
    return %c0_i32, %c0_i32_0 : i32, i32
  }
  func.func @transform_6(%arg0: i32) -> (i32, i32) {
    %c0_i32 = arith.constant 0 : i32
    %c0_i32_0 = arith.constant 0 : i32
    %c0_i32_1 = arith.constant 0 : i32
    return %c0_i32, %c0_i32_0 : i32, i32
  }
  func.func @transform_7(%arg0: i32) -> (i32, i32) {
    %c0_i32 = arith.constant 0 : i32
    %c0_i32_0 = arith.constant 0 : i32
    %c0_i32_1 = arith.constant 0 : i32
    return %c0_i32, %c0_i32_0 : i32, i32
  }
  func.func @transform_8(%arg0: i32) -> (i32, i32) {
    %c0_i32 = arith.constant 0 : i32
    %c0_i32_0 = arith.constant 0 : i32
    %c0_i32_1 = arith.constant 0 : i32
    return %c0_i32, %c0_i32_0 : i32, i32
  }
  func.func @transform_9(%arg0: i32) -> (i32, i32) {
    %c0_i32 = arith.constant 0 : i32
    %c0_i32_0 = arith.constant 0 : i32
    %c0_i32_1 = arith.constant 0 : i32
    return %c0_i32, %c0_i32_0 : i32, i32
  }
  func.func @transform_10(%arg0: i32) -> (i32, i32) {
    %c0_i32 = arith.constant 0 : i32
    %c0_i32_0 = arith.constant 0 : i32
    %c0_i32_1 = arith.constant 0 : i32
    return %c0_i32, %c0_i32_0 : i32, i32
  }
  func.func @transform_11(%arg0: i32) -> (i32, i32, i32) {
    %c0_i32 = arith.constant 0 : i32
    %c0_i32_0 = arith.constant 0 : i32
    %c0_i32_1 = arith.constant 0 : i32
    return %arg0, %c0_i32, %c0_i32_0 : i32, i32, i32
  }
}

</mosaic_0001>

<bundles_post_ra>
// kernel: moco_classifier_forward.1
= control target key start
LH: loop header
LB: loop body
LE: loop exit
PB: predicated region body
PF: predicated region fallthrough
CT: control target
= control target key end

     0   :  { %s4376_s0 = inlined_call_operand.vmem [shape: f32[2,134,2], index: 0, kind: input, shape index: {}]   ;;  %s4377_s1 = inlined_call_operand.vmem [shape: f32[2,56], index: 1, kind: input, shape index: {}]   ;;  %s4378_s2 = inlined_call_operand.vmem [shape: f32[1,8], index: 2, kind: input, shape index: {}]   ;;  %s4379_s3 = inlined_call_operand.vmem [shape: f32[8,176], index: 3, kind: input, shape index: {}]   ;;  %s4380_s4 = inlined_call_operand.vmem [shape: f32[1,16], index: 4, kind: input, shape index: {}]   ;;  %s4381_s5 = inlined_call_operand.vmem [shape: f32[16,352], index: 5, kind: input, shape index: {}]   ;;  %s4382_s6 = inlined_call_operand.vmem [shape: f32[1,32], index: 6, kind: input, shape index: {}]   ;;  %s4383_s7 = inlined_call_operand.vmem [shape: f32[32,448], index: 7, kind: input, shape index: {}]   ;;  %s4384_s8 = inlined_call_operand.vmem [shape: f32[1,64], index: 8, kind: input, shape index: {}]   ;;  %s4385_s9 = inlined_call_operand.vmem [shape: f32[64,5], index: 9, kind: input, shape index: {}]   ;;  %s4386_s10 = inlined_call_operand.vmem [shape: f32[1,5], index: 10, kind: input, shape index: {}]   ;;  %s4387_s11 = inlined_call_operand.hbm [shape: f32[2,1,5], index: 11, kind: output, shape index: {}]  }
   0x1   :  { %4404 = sst [smem:[#allocation54_spill]] %s4376_s0 }
   0x2   :  { %4405 = sst [smem:[#allocation55_spill]] %s4377_s1 }
   0x3   :  { %16 = vsyncpa [#allocation6], 0 }
   0x4   :  { %18 = vsyncpa [#allocation6 + $0x1], 0  ;;  %s2955_s17 = smov 0   ;;  %s2957_s18 = smov 0  }
   0x5   :  { %s2959_s19 = smov 0   ;;  %s2961_s20 = smov 0  }
   0x6 LB: > { %s2976_s21 = sadd.s32 4294967295, %s2880_s20   ;;  %s2659_s22 = sadd.s32 4294967294, %s2880_s20   ;;  %s2880_s20 = sphi %s2961_s20, %s4521_s20   ;;  %s2876_s19 = sphi %s2959_s19, %s4520_s19   ;;  %s2872_s18 = sphi %s2957_s18, %s4519_s18   ;;  %s2868_s17 = sphi %s2955_s17, %s4518_s17  }
   0x7   : > { %s2980_s23 = sadd.s32 1, %s2880_s20   ;;  %s267_s24 = sadd.s32 1, %s2876_s19 }
   0x8   : > { %s264_s25 = ssub.s32 %s2880_s20, %s2980_s23  ;;  %p277_p0 = scmp.ne.s32.totalorder %s2876_s19, %s2872_s18 }
   0x9   : > { %p265_p1 = scmp.eq.s32.totalorder %s264_s25, 0  ;;  %p278_p2 = scmp.eq.s32.totalorder %s2976_s21, 1 }
   0xa   : > { %p283_p3 = scmp.ne.s32.totalorder %s2872_s18, %s2868_s17  ;;  %p284_p4 = scmp.eq.s32.totalorder %s2659_s22, 1 }
   0xb   : > { %s2991_s26 = scalar_select %p265_p1, %s2876_s19, %s267_s24  }
   0xc   : > { %p2993_p5 = por %p278_p2, %p277_p0  ;;  %p2997_p6 = por %p284_p4, %p283_p3 }
   0xd   : > { %p2662_p7 = scmp.ge.s32.totalorder %s2880_s20, 1  ;;  %p340_p8 = scmp.lt.s32.totalorder %s2880_s20, 3 }
   0xf   : > { %p341_p9 = pnand %p2662_p7, %p340_p8 }
  0x11   : > { %344 = sbr.rel (%p341_p9) target bundleno = 2317 (0x90d), region = 64 }
  0x16   : > { %s4408_s1 = sld [smem:[#allocation55_spill]]  ;;  %vm455_vm0 = vcmask 1041408   ;;  %p379_p10 = scmp.lt.s32.totalorder %s2976_s21, 1  ;;  %vm403_vm1 = vcmask 15360   ;;  %vm544_vm2 = vcmask 1046528   ;;  %vm642_vm3 = vcmask 1045504  }
  0x17   : > { %s4409_s0 = sld [smem:[#allocation54_spill]]  ;;  %s2882_s22 = smov 120   ;;  %vm740_vm4 = vcmask 1044480   ;;  %vm838_vm5 = vcmask 1043456   ;;  %vm936_vm6 = vcmask 1042432   ;;  %vm1226_vm15 = vcmask 61440  }
  0x18   : > { %s380_s12 = scalar_select %p379_p10, %s2976_s21, 1 }
  0x19   : > { %s2883_s24 = smov 112   ;;  %s2884_s25 = smov 104  }
  0x1a   : > { %s2759_s13 = smul.u32 136, %s380_s12  ;;  %s4402_s29 = smov 96  }
  0x1b   : > { %s2886_s30 = smov 88   ;;  %s2887_s12 = smov 80  }
  0x1c   : > { %v401_v0 = vld [vmem:[%s4408_s1] sm:$0x3]  ;;  %s2892_s14 = smov 48   ;;  %s2893_s15 = smov 16  }
  0x1d   : > { %2664 = vmatpush.msk.msra.mxu0 %vm455_vm0, %v401_v0  ;;  %2758 = vmatpush.msk.msra.mxu2 %vm455_vm0, %v401_v0  ;;  %s3013_s16 = scalar_lea.vmem %s4409_s0, %s2759_s13  ;;  %s4400_s13 = smov 64  }
  0x1e   : > { %v384_v1 = vld [vmem:[%s3013_s16] sm:$0xff]  ;;  %v385_v2 = vld [vmem:[%s3013_s16 + $0x8] sm:$0xff]  ;;  %v386_v3 = vld [vmem:[%s3013_s16 + $0x10] sm:$0xff] }
  0x1f   : > { %2665 = vmatmul.msk.f32.vlgmr.msra.gmra.mxu0 %vm403_vm1, %v384_v1  ;;  %v387_v4 = vld [vmem:[%s3013_s16 + $0x18] sm:$0xff]  ;;  %v388_v5 = vld [vmem:[%s3013_s16 + $0x20] sm:$0xff]  ;;  %v389_v6 = vld [vmem:[%s3013_s16 + $0x28] sm:$0xff] }
  0x20   : > { %v390_v7 = vld [vmem:[%s3013_s16 + $0x30] sm:$0xff]  ;;  %v391_v8 = vld [vmem:[%s3013_s16 + $0x38] sm:$0xff]  ;;  %v392_v9 = vld [vmem:[%s3013_s16 + $0x40] sm:$0xff] }
  0x21   : > { %v393_v10 = vld [vmem:[%s3013_s16 + $0x48] sm:$0xff]  ;;  %v394_v11 = vld [vmem:[%s3013_s16 + $0x50] sm:$0xff]  ;;  %v395_v12 = vld [vmem:[%s3013_s16 + $0x58] sm:$0xff] }
  0x22   : > { %v396_v13 = vld [vmem:[%s3013_s16 + $0x60] sm:$0xff]  ;;  %v397_v15 = vld [vmem:[%s3013_s16 + $0x68] sm:$0xff]  ;;  %v398_v26 = vld [vmem:[%s3013_s16 + $0x70] sm:$0xff] }
  0x23   : > { %v399_v35 = vld [vmem:[%s3013_s16 + $0x78] sm:$0xff]  ;;  %v400_v51 = vld [vmem:[%s3013_s16 + $0x80] sm:$0x3f] }
  0x24   : > { %2681 = vmatmul.msk.f32.vlgmr.msra.gmra.mxu2 %vm403_vm1, %v400_v51 }
  0x27   : > { %2666 = vmatmul.msk.f32.gmra.mxu0 %vm403_vm1, %v385_v2 }
  0x2f   : > { %2667 = vmatmul.msk.f32.gmra.mxu0 %vm403_vm1, %v386_v3 }
  0x37   : > { %2668 = vmatmul.msk.f32.gmra.mxu0 %vm403_vm1, %v387_v4 }
  0x3f   : > { %2669 = vmatmul.msk.f32.gmra.mxu0 %vm403_vm1, %v388_v5 }
  0x47   : > { %2670 = vmatmul.msk.f32.gmra.mxu0 %vm403_vm1, %v389_v6 }
  0x4f   : > { %2671 = vmatmul.msk.f32.gmra.mxu0 %vm403_vm1, %v390_v7 }
  0x57   : > { %2672 = vmatmul.msk.f32.gmra.mxu0 %vm403_vm1, %v391_v8 }
  0x5f   : > { %2673 = vmatmul.msk.f32.gmra.mxu0 %vm403_vm1, %v392_v9 }
  0x67   : > { %2674 = vmatmul.msk.f32.gmra.mxu0 %vm403_vm1, %v393_v10 }
  0x6f   : > { %2675 = vmatmul.msk.f32.gmra.mxu0 %vm403_vm1, %v394_v11 }
  0x77   : > { %2676 = vmatmul.msk.f32.gmra.mxu0 %vm403_vm1, %v395_v12 }
  0x7f   : > { %2677 = vmatmul.msk.f32.gmra.mxu0 %vm403_vm1, %v396_v13 }
  0x87   : > { %2678 = vmatmul.msk.f32.gmra.mxu0 %vm403_vm1, %v397_v15 }
  0x8f   : > { %2679 = vmatmul.msk.f32.gmra.mxu0 %vm403_vm1, %v398_v26 }
  0x97   : > { %2680 = vmatmul.msk.f32.gmra.mxu0 %vm403_vm1, %v399_v35  ;;  %vm1229_vm1 = vcmask 64512  }
  0x9c   : > { %v3041_v14 = vpop.f32.mrf.mxu0 }
  0x9d   : > { %4410 = vst [vmem:[#allocation8_spill] sm:$0xff] %v3041_v14  ;;  %v545_v17 = vrot.slane %v3041_v14, 1  ;;  %v643_v22 = vrot.slane %v3041_v14, 2 }
  0xa4   : > { %v3045_v16 = vpop.f32.mrf.mxu0 }
  0xa5   : > { %4411 = vst [vmem:[#allocation9_spill] sm:$0xff] %v3045_v16  ;;  %v546_v18 = vrot.slane %v3045_v16, 1  ;;  %v644_v20 = vrot.slane %v3045_v16, 2  ;;  %v4388_v30 = vrot.slane %v3045_v16, 3 }
  0xa7   : > { %v547_v19 = vsel %vm544_vm2, %v545_v17, %v546_v18  ;;  %v645_v24 = vsel %vm642_vm3, %v643_v22, %v644_v20 }
  0xa8   : > { %578 = vrot.lane.b32.xlu0 %v547_v19, %s2882_s22 }
  0xac   : > { %v3052_v21 = vpop.f32.mrf.mxu0 }
  0xad   : > { %4412 = vst [vmem:[#allocation10_spill] sm:$0xff] %v3052_v21  ;;  %v646_v23 = vrot.slane %v3052_v21, 2  ;;  %v744_v27 = vrot.slane %v3052_v21, 3  ;;  %v548_v28 = vrot.slane %v3052_v21, 1  ;;  %v4390_v40 = vrot.slane %v3052_v21, 4 }
  0xaf   : > { %v647_v25 = vsel %vm642_vm3, %v644_v20, %v646_v23  ;;  %v745_v32 = vsel %vm740_vm4, %v4388_v30, %v744_v27  ;;  %v549_v33 = vsel %vm544_vm2, %v546_v18, %v548_v28 }
  0xb0   : > { %676 = vrot.lane.b32.xlu0 %v645_v24, %s2883_s24  ;;  %678 = vrot.lane.b32.xlu1 %v647_v25, %s2883_s24 }
  0xb4   : > { %v3064_v29 = vpop.f32.mrf.mxu0 }
  0xb5   : > { %4413 = vst [vmem:[#allocation11_spill] sm:$0xff] %v3064_v29  ;;  %v746_v31 = vrot.slane %v3064_v29, 3  ;;  %v648_v36 = vrot.slane %v3064_v29, 2  ;;  %v550_v37 = vrot.slane %v3064_v29, 1  ;;  %v844_v38 = vrot.slane %v3064_v29, 4 }
  0xb7   : > { %v747_v34 = vsel %vm740_vm4, %v744_v27, %v746_v31  ;;  %v649_v41 = vsel %vm642_vm3, %v646_v23, %v648_v36  ;;  %v551_v42 = vsel %vm544_vm2, %v548_v28, %v550_v37  ;;  %v845_v43 = vsel %vm838_vm5, %v4390_v40, %v844_v38 }
  0xb8   : > { %776 = vrot.lane.b32.xlu1 %v745_v32, %s2884_s25  ;;  %580 = vrot.lane.b32.xlu0 %v549_v33, %s2882_s22 }
  0xb9   : > { %778 = vrot.lane.b32.xlu2 %v747_v34, %s2884_s25 }
  0xbc   : > { %v3081_v39 = vpop.f32.mrf.mxu0 }
  0xbd   : > { %4414 = vst [vmem:[#allocation12_spill] sm:$0xff] %v3081_v39  ;;  %v650_v44 = vrot.slane %v3081_v39, 2  ;;  %v552_v45 = vrot.slane %v3081_v39, 1  ;;  %v748_v46 = vrot.slane %v3081_v39, 3  ;;  %v846_v52 = vrot.slane %v3081_v39, 4 }
  0xbe   : > { %v4392_v62 = vrot.slane %v3081_v39, 5 }
  0xbf   : > { %v651_v48 = vsel %vm642_vm3, %v648_v36, %v650_v44  ;;  %v553_v49 = vsel %vm544_vm2, %v550_v37, %v552_v45  ;;  %v749_v50 = vsel %vm740_vm4, %v746_v31, %v748_v46  ;;  %v847_v55 = vsel %vm838_vm5, %v844_v38, %v846_v52 }
  0xc0   : > { %680 = vrot.lane.b32.xlu1 %v649_v41, %s2883_s24  ;;  %582 = vrot.lane.b32.xlu0 %v551_v42, %s2882_s22 }
  0xc1   : > { %876 = vrot.lane.b32.xlu2 %v845_v43, %s4402_s29 }
  0xc4   : > { %v3095_v47 = vpop.f32.mrf.mxu0 }
  0xc5   : > { %v652_v53 = vrot.slane %v3095_v47, 2  ;;  %v750_v54 = vrot.slane %v3095_v47, 3  ;;  %v946_v59 = vrot.slane %v3095_v47, 5  ;;  %v554_v60 = vrot.slane %v3095_v47, 1 }
  0xc6   : > { %v848_v2 = vrot.slane %v3095_v47, 4  ;;  %v4391_v5 = vrot.slane %v3095_v47, 6 }
  0xc7   : > { %v653_v56 = vsel %vm642_vm3, %v650_v44, %v652_v53  ;;  %v751_v57 = vsel %vm740_vm4, %v748_v46, %v750_v54  ;;  %v947_v63 = vsel %vm936_vm6, %v4392_v62, %v946_v59  ;;  %v555_v0 = vsel %vm544_vm2, %v552_v45, %v554_v60 }
  0xc8   : > { %682 = vrot.lane.b32.xlu1 %v651_v48, %s2883_s24  ;;  %584 = vrot.lane.b32.xlu0 %v553_v49, %s2882_s22  ;;  %v849_v6 = vsel %vm838_vm5, %v846_v52, %v848_v2 }
  0xc9   : > { %780 = vrot.lane.b32.xlu2 %v749_v50, %s2884_s25 }
  0xcc   : > { %v3113_v58 = vpop.f32.mrf.mxu0 }
  0xcd   : > { %v752_v61 = vrot.slane %v3113_v58, 3  ;;  %v654_v3 = vrot.slane %v3113_v58, 2  ;;  %v1045_v4 = vrot.slane %v3113_v58, 6  ;;  %v948_v10 = vrot.slane %v3113_v58, 5 }
  0xce   : > { %v556_v11 = vrot.slane %v3113_v58, 1  ;;  %v850_v18 = vrot.slane %v3113_v58, 4 }
  0xcf   : > { %v753_v1 = vsel %vm740_vm4, %v750_v54, %v752_v61  ;;  %v655_v7 = vsel %vm642_vm3, %v652_v53, %v654_v3  ;;  %v1046_v8 = vsel %vm455_vm0, %v4391_v5, %v1045_v4  ;;  %v949_v13 = vsel %vm936_vm6, %v946_v59, %v948_v10 }
  0xd0   : > { %878 = vrot.lane.b32.xlu0 %v847_v55, %s4402_s29  ;;  %684 = vrot.lane.b32.xlu1 %v653_v56, %s2883_s24  ;;  %v557_v15 = vsel %vm544_vm2, %v554_v60, %v556_v11  ;;  %v851_v22 = vsel %vm838_vm5, %v848_v2, %v850_v18 }
  0xd1   : > { %782 = vrot.lane.b32.xlu2 %v751_v57, %s2884_s25 }
  0xd4   : > { %v3139_v9 = vpop.f32.mrf.mxu0 }
  0xd5   : > { %v754_v12 = vrot.slane %v3139_v9, 3  ;;  %v656_v19 = vrot.slane %v3139_v9, 2  ;;  %v1047_v20 = vrot.slane %v3139_v9, 6  ;;  %v950_v26 = vrot.slane %v3139_v9, 5 }
  0xd6   : > { %v558_v27 = vrot.slane %v3139_v9, 1  ;;  %v852_v34 = vrot.slane %v3139_v9, 4 }
  0xd7   : > { %v755_v17 = vsel %vm740_vm4, %v752_v61, %v754_v12  ;;  %v657_v23 = vsel %vm642_vm3, %v654_v3, %v656_v19  ;;  %v1048_v24 = vsel %vm455_vm0, %v1045_v4, %v1047_v20  ;;  %v951_v31 = vsel %vm936_vm6, %v948_v10, %v950_v26 }
  0xd8   : > { %978 = vrot.lane.b32.xlu1 %v947_v63, %s2886_s30  ;;  %586 = vrot.lane.b32.xlu0 %v555_v0, %s2882_s22  ;;  %v559_v32 = vsel %vm544_vm2, %v556_v11, %v558_v27  ;;  %v853_v37 = vsel %vm838_vm5, %v850_v18, %v852_v34 }
  0xd9   : > { %784 = vrot.lane.b32.xlu2 %v753_v1, %s2884_s25 }
  0xdc   : > { %v3159_v25 = vpop.f32.mrf.mxu0 }
  0xdd   : > { %v756_v28 = vrot.slane %v3159_v25, 3  ;;  %v658_v35 = vrot.slane %v3159_v25, 2  ;;  %v1049_v36 = vrot.slane %v3159_v25, 6  ;;  %v952_v43 = vrot.slane %v3159_v25, 5 }
  0xde   : > { %v560_v44 = vrot.slane %v3159_v25, 1  ;;  %v854_v50 = vrot.slane %v3159_v25, 4 }
  0xdf   : > { %v757_v33 = vsel %vm740_vm4, %v754_v12, %v756_v28  ;;  %v659_v38 = vsel %vm642_vm3, %v656_v19, %v658_v35  ;;  %v1050_v41 = vsel %vm455_vm0, %v1047_v20, %v1049_v36  ;;  %v953_v46 = vsel %vm936_vm6, %v950_v26, %v952_v43 }
  0xe0   : > { %880 = vrot.lane.b32.xlu0 %v849_v6, %s4402_s29  ;;  %686 = vrot.lane.b32.xlu1 %v655_v7, %s2883_s24  ;;  %v561_v48 = vsel %vm544_vm2, %v558_v27, %v560_v44  ;;  %v855_v53 = vsel %vm838_vm5, %v852_v34, %v854_v50 }
  0xe1   : > { %1077 = vrot.lane.b32.xlu2 %v1046_v8, %s2887_s12 }
  0xe4   : > { %v3179_v42 = vpop.f32.mrf.mxu0 }
  0xe5   : > { %v758_v45 = vrot.slane %v3179_v42, 3  ;;  %v660_v51 = vrot.slane %v3179_v42, 2  ;;  %v1051_v52 = vrot.slane %v3179_v42, 6  ;;  %v954_v59 = vrot.slane %v3179_v42, 5 }
  0xe6   : > { %v562_v60 = vrot.slane %v3179_v42, 1  ;;  %v856_v4 = vrot.slane %v3179_v42, 4 }
  0xe7   : > { %v759_v49 = vsel %vm740_vm4, %v756_v28, %v758_v45  ;;  %v661_v54 = vsel %vm642_vm3, %v658_v35, %v660_v51  ;;  %v1052_v55 = vsel %vm455_vm0, %v1049_v36, %v1051_v52  ;;  %v955_v63 = vsel %vm936_vm6, %v952_v43, %v954_v59 }
  0xe8   : > { %980 = vrot.lane.b32.xlu1 %v949_v13, %s2886_s30  ;;  %588 = vrot.lane.b32.xlu0 %v557_v15, %s2882_s22  ;;  %v563_v0 = vsel %vm544_vm2, %v560_v44, %v562_v60  ;;  %v857_v8 = vsel %vm838_vm5, %v854_v50, %v856_v4 }
  0xe9   : > { %786 = vrot.lane.b32.xlu2 %v755_v17, %s2884_s25 }
  0xec   : > { %v3199_v56 = vpop.f32.mrf.mxu0 }
  0xed   : > { %v760_v61 = vrot.slane %v3199_v56, 3  ;;  %v662_v6 = vrot.slane %v3199_v56, 2  ;;  %v1053_v7 = vrot.slane %v3199_v56, 6  ;;  %v956_v18 = vrot.slane %v3199_v56, 5 }
  0xee   : > { %v564_v19 = vrot.slane %v3199_v56, 1 }
  0xef   : > { %v761_v1 = vsel %vm740_vm4, %v758_v45, %v760_v61  ;;  %v663_v10 = vsel %vm642_vm3, %v660_v51, %v662_v6  ;;  %v1054_v11 = vsel %vm455_vm0, %v1051_v52, %v1053_v7 }
  0xf0   : > { %882 = vrot.lane.b32.xlu0 %v851_v22, %s4402_s29  ;;  %688 = vrot.lane.b32.xlu1 %v657_v23, %s2883_s24  ;;  %v957_v22 = vsel %vm936_vm6, %v954_v59, %v956_v18  ;;  %v565_v23 = vsel %vm544_vm2, %v562_v60, %v564_v19 }
  0xf1   : > { %1079 = vrot.lane.b32.xlu2 %v1048_v24, %s2887_s12 }
  0xf4   : > { %v3225_v12 = vpop.f32.mrf.mxu0 }
  0xf5   : > { %v762_v20 = vrot.slane %v3225_v12, 3  ;;  %v958_v44 = vrot.slane %v3225_v12, 5  ;;  %v566_v45 = vrot.slane %v3225_v12, 1 }
  0xf7   : > { %v763_v24 = vsel %vm740_vm4, %v760_v61, %v762_v20 }
  0xf8   : > { %982 = vrot.lane.b32.xlu1 %v951_v31, %s2886_s30  ;;  %590 = vrot.lane.b32.xlu0 %v559_v32, %s2882_s22  ;;  %v858_v31 = vrot.slane %v3199_v56, 4  ;;  %v664_v32 = vrot.slane %v3225_v12, 2 }
  0xf9   : > { %788 = vrot.lane.b32.xlu2 %v757_v33, %s2884_s25  ;;  %v1055_v33 = vrot.slane %v3225_v12, 6 }
  0xfa   : > { %v859_v34 = vsel %vm838_vm5, %v856_v4, %v858_v31  ;;  %v665_v35 = vsel %vm642_vm3, %v662_v6, %v664_v32 }
  0xfb   : > { %v1056_v36 = vsel %vm455_vm0, %v1053_v7, %v1055_v33 }
 0x100   : > { %884 = vrot.lane.b32.xlu0 %v853_v37, %s4402_s29  ;;  %690 = vrot.lane.b32.xlu1 %v659_v38, %s2883_s24  ;;  %v3257_v37 = vpop.f32.mrf.mxu0 }
 0x101   : > { %1081 = vrot.lane.b32.xlu2 %v1050_v41, %s2887_s12  ;;  %v1057_v59 = vrot.slane %v3257_v37, 6  ;;  %v862_v7 = vrot.slane %v3257_v37, 4 }
 0x108   : > { %984 = vrot.lane.b32.xlu1 %v953_v46, %s2886_s30  ;;  %592 = vrot.lane.b32.xlu0 %v561_v48, %s2882_s22  ;;  %v764_v46 = vrot.slane %v3257_v37, 3  ;;  %v959_v48 = vsel %vm936_vm6, %v956_v18, %v958_v44 }
 0x109   : > { %790 = vrot.lane.b32.xlu2 %v759_v49, %s2884_s25  ;;  %v567_v49 = vsel %vm544_vm2, %v564_v19, %v566_v45 }
 0x10a   : > { %v765_v50 = vsel %vm740_vm4, %v762_v20, %v764_v46 }
 0x110   : > { %886 = vrot.lane.b32.xlu0 %v855_v53, %s4402_s29  ;;  %692 = vrot.lane.b32.xlu1 %v661_v54, %s2883_s24  ;;  %v860_v54 = vrot.slane %v3225_v12, 4 }
 0x111   : > { %1083 = vrot.lane.b32.xlu2 %v1052_v55, %s2887_s12  ;;  %v568_v55 = vrot.slane %v3257_v37, 1 }
 0x112   : > { %v861_v60 = vsel %vm838_vm5, %v858_v31, %v860_v54 }
 0x113   : > { %v3202_v57 = vpop.permute.xlu2 %778  ;;  %v569_v61 = vsel %vm544_vm2, %v566_v45, %v568_v55 }
 0x114   : > { %4415 = vst [vmem:[#allocation13_spill] sm:$0xff] %v3202_v57  ;;  %v1037_v57 = vrot.slane %v3052_v21, 6 }
 0x118   : > { %986 = vrot.lane.b32.xlu1 %v955_v63, %s2886_s30  ;;  %594 = vrot.lane.b32.xlu0 %v563_v0, %s2882_s22  ;;  %v1058_v63 = vsel %vm455_vm0, %v1055_v33, %v1057_v59  ;;  %v3289_v0 = vpop.f32.mrf.mxu0 }
 0x119   : > { %792 = vrot.lane.b32.xlu2 %v761_v1, %s2884_s25  ;;  %v570_v31 = vrot.slane %v3289_v0, 1 }
 0x11a   : > { %v3213_v2 = vpop.permute.xlu0 %578 }
 0x11b   : > { %4416 = vst [vmem:[#allocation14_spill] sm:$0xff] %v3213_v2  ;;  %v3215_v3 = vpop.permute.xlu2 %876 }
 0x11c   : > { %4417 = vst [vmem:[#allocation15_spill] sm:$0xff] %v3215_v3  ;;  %v942_v3 = vrot.slane %v3064_v29, 5 }
 0x120   : > { %888 = vrot.lane.b32.xlu0 %v857_v8, %s4402_s29  ;;  %694 = vrot.lane.b32.xlu1 %v663_v10, %s2883_s24  ;;  %v666_v8 = vrot.slane %v3257_v37, 2  ;;  %v668_v10 = vrot.slane %v3289_v0, 2 }
 0x121   : > { %1085 = vrot.lane.b32.xlu2 %v1054_v11, %s2887_s12  ;;  %v863_v11 = vsel %vm838_vm5, %v860_v54, %v862_v7  ;;  %v3331_v54 = vpop.f32.mrf.mxu0 }
 0x122   : > { %v3228_v13 = vpop.permute.xlu0 %676  ;;  %v3230_v15 = vpop.permute.xlu1 %678  ;;  %v667_v18 = vsel %vm642_vm3, %v664_v32, %v666_v8  ;;  %v669_v19 = vsel %vm642_vm3, %v666_v8, %v668_v10  ;;  %v766_v32 = vrot.slane %v3289_v0, 3 }
 0x123   : > { %4418 = vst [vmem:[#allocation16_spill] sm:$0xff] %v3228_v13  ;;  %v3232_v17 = vpop.permute.xlu2 %780 }
 0x124   : > { %4419 = vst [vmem:[#allocation17_spill] sm:$0xff] %v3230_v15 }
 0x125   : > { %4420 = vst [vmem:[#allocation18_spill] sm:$0xff] %v3232_v17 }
 0x128   : > { %988 = vrot.lane.b32.xlu1 %v957_v22, %s2886_s30  ;;  %596 = vrot.lane.b32.xlu0 %v565_v23, %s2882_s22 }
 0x129   : > { %794 = vrot.lane.b32.xlu2 %v763_v24, %s2884_s25  ;;  %v960_v24 = vrot.slane %v3257_v37, 5 }
 0x12a   : > { %v3243_v26 = vpop.permute.xlu1 %776  ;;  %v3245_v27 = vpop.permute.xlu0 %580 }
 0x12b   : > { %4421 = vst [vmem:[#allocation19_spill] sm:$0xff] %v3243_v26  ;;  %v3247_v28 = vpop.permute.xlu2 %782  ;;  %v961_v33 = vsel %vm936_vm6, %v958_v44, %v960_v24  ;;  %v864_v44 = vrot.slane %v3289_v0, 4 }
 0x12c   : > { %4422 = vst [vmem:[#allocation20_spill] sm:$0xff] %v3245_v27 }
 0x12d   : > { %4423 = vst [vmem:[#allocation21_spill] sm:$0xff] %v3247_v28 }
 0x130   : > { %890 = vrot.lane.b32.xlu0 %v859_v34, %s4402_s29  ;;  %696 = vrot.lane.b32.xlu1 %v665_v35, %s2883_s24  ;;  %v571_v34 = vsel %vm544_vm2, %v568_v55, %v570_v31  ;;  %v767_v35 = vsel %vm740_vm4, %v764_v46, %v766_v32  ;;  %v865_v55 = vsel %vm838_vm5, %v862_v7, %v864_v44  ;;  %v4389_v7 = vrot.slane %v3331_v54, 6 }
 0x131   : > { %1087 = vrot.lane.b32.xlu2 %v1056_v36, %s2887_s12 }
 0x132   : > { %v3260_v38 = vpop.permute.xlu1 %680  ;;  %v3262_v41 = vpop.permute.xlu0 %582 }
 0x133   : > { %4424 = vst [vmem:[#allocation22_spill] sm:$0xff] %v3260_v38  ;;  %v3264_v43 = vpop.permute.xlu2 %784 }
 0x134   : > { %4425 = vst [vmem:[#allocation23_spill] sm:$0xff] %v3262_v41 }
 0x135   : > { %4426 = vst [vmem:[#allocation24_spill] sm:$0xff] %v3264_v43 }
 0x138   : > { %990 = vrot.lane.b32.xlu1 %v959_v48, %s2886_s30  ;;  %598 = vrot.lane.b32.xlu0 %v567_v49, %s2882_s22  ;;  %v962_v49 = vrot.slane %v3289_v0, 5 }
 0x139   : > { %796 = vrot.lane.b32.xlu2 %v765_v50, %s2884_s25  ;;  %v1059_v50 = vrot.slane %v3289_v0, 6 }
 0x13a   : > { %v3275_v51 = vpop.permute.xlu1 %682  ;;  %v3277_v52 = vpop.permute.xlu0 %584  ;;  %v963_v46 = vsel %vm936_vm6, %v960_v24, %v962_v49 }
 0x13b   : > { %4427 = vst [vmem:[#allocation25_spill] sm:$0xff] %v3275_v51  ;;  %v3279_v53 = vpop.permute.xlu2 %1077  ;;  %v1062_v24 = vsel %vm455_vm0, %v1059_v50, %v4389_v7 }
 0x13c   : > { %4428 = vst [vmem:[#allocation26_spill] sm:$0xff] %v3277_v52 }
 0x13d   : > { %4429 = vst [vmem:[#allocation27_spill] sm:$0xff] %v3279_v53 }
 0x140   : > { %892 = vrot.lane.b32.xlu0 %v861_v60, %s4402_s29  ;;  %600 = vrot.lane.b32.xlu1 %v569_v61, %s2882_s22  ;;  %v1060_v60 = vsel %vm455_vm0, %v1057_v59, %v1059_v50 }
 0x141   : > { %1089 = vrot.lane.b32.xlu2 %v1058_v63, %s2887_s12 }
 0x142   : > { %v3292_v1 = vpop.permute.xlu0 %878  ;;  %v3294_v4 = vpop.permute.xlu1 %684 }
 0x143   : > { %4430 = vst [vmem:[#allocation28_spill] sm:$0xff] %v3292_v1  ;;  %v3296_v6 = vpop.permute.xlu2 %786 }
 0x144   : > { %4431 = vst [vmem:[#allocation29_spill] sm:$0xff] %v3294_v4 }
 0x145   : > { %4432 = vst [vmem:[#allocation30_spill] sm:$0xff] %v3296_v6 }
 0x148   : > { %894 = vrot.lane.b32.xlu0 %v863_v11, %s4402_s29  ;;  %698 = vrot.lane.b32.xlu1 %v667_v18, %s2883_s24  ;;  %v768_v11 = vrot.slane %v3331_v54, 3  ;;  %v572_v18 = vrot.slane %v3331_v54, 1 }
 0x149   : > { %700 = vrot.lane.b32.xlu2 %v669_v19, %s2883_s24 }
 0x14a   : > { %v3307_v20 = vpop.permute.xlu1 %978  ;;  %v3309_v22 = vpop.permute.xlu0 %586  ;;  %v769_v19 = vsel %vm740_vm4, %v766_v32, %v768_v11  ;;  %v573_v59 = vsel %vm544_vm2, %v570_v31, %v572_v18  ;;  %v866_v31 = vrot.slane %v3331_v54, 4  ;;  %v670_v32 = vrot.slane %v3331_v54, 2 }
 0x14b   : > { %4433 = vst [vmem:[#allocation31_spill] sm:$0xff] %v3307_v20  ;;  %v3311_v23 = vpop.permute.xlu2 %1079 }
 0x14c   : > { %4434 = vst [vmem:[#allocation32_spill] sm:$0xff] %v3309_v22 }
 0x14d   : > { %4435 = vst [vmem:[#allocation33_spill] sm:$0xff] %v3311_v23 }
 0x150   : > { %992 = vrot.lane.b32.xlu1 %v961_v33, %s2886_s30  ;;  %602 = vrot.lane.b32.xlu0 %v571_v34, %s2882_s22  ;;  %v3355_v33 = vpop.f32.mrf.mxu0 }
 0x151   : > { %798 = vrot.lane.b32.xlu2 %v767_v35, %s2884_s25  ;;  %v672_v50 = vrot.slane %v3355_v33, 2 }
 0x152   : > { %v3322_v36 = vpop.permute.xlu0 %880  ;;  %v3324_v45 = vpop.permute.xlu1 %686 }
 0x153   : > { %4436 = vst [vmem:[#allocation34_spill] sm:$0xff] %v3322_v36  ;;  %v3326_v48 = vpop.permute.xlu2 %788 }
 0x154   : > { %4437 = vst [vmem:[#allocation35_spill] sm:$0xff] %v3324_v45 }
 0x155   : > { %4438 = vst [vmem:[#allocation36_spill] sm:$0xff] %v3326_v48 }
 0x158   : > { %994 = vrot.lane.b32.xlu1 %v963_v46, %s2886_s30  ;;  %896 = vrot.lane.b32.xlu0 %v865_v55, %s4402_s29  ;;  %v524_v55 = vpop.f32.mrf.mxu2 }
 0x159   : > { %1091 = vrot.lane.b32.xlu2 %v1060_v60, %s2887_s12  ;;  %v867_v60 = vsel %vm838_vm5, %v864_v44, %v866_v31  ;;  %v772_v40 = vrot.slane %v524_v55, 3  ;;  %v964_v44 = vrot.slane %v3331_v54, 5  ;;  %v674_v62 = vrot.slane %v524_v55, 2 }
 0x15a   : > { %v3339_v61 = vpop.permute.xlu1 %980  ;;  %v3341_v63 = vpop.permute.xlu0 %588  ;;  %v870_v53 = vrot.slane %v524_v55, 4 }
 0x15b   : > { %4439 = vst [vmem:[#allocation37_spill] sm:$0xff] %v3339_v61  ;;  %v3343_v8 = vpop.permute.xlu2 %1081  ;;  %v675_v2 = vsel %vm642_vm3, %v672_v50, %v674_v62  ;;  %v968_v62 = vrot.slane %v524_v55, 5 }
 0x15c   : > { %4440 = vst [vmem:[#allocation38_spill] sm:$0xff] %v3343_v8 }
 0x160   : > { %800 = vrot.lane.b32.xlu0 %v769_v19, %s2884_s25  ;;  %604 = vrot.lane.b32.xlu1 %v573_v59, %s2882_s22  ;;  %v671_v19 = vsel %vm642_vm3, %v668_v10, %v670_v32  ;;  %v673_v59 = vsel %vm642_vm3, %v670_v32, %v672_v50  ;;  %v574_v10 = vrot.slane %v3355_v33, 1 }
 0x161   : > { %1093 = vrot.lane.b32.xlu2 %v1062_v24, %s2887_s12  ;;  %v576_v24 = vrot.slane %v524_v55, 1 }
 0x162   : > { %v3358_v34 = vpop.permute.xlu0 %882  ;;  %v3360_v35 = vpop.permute.xlu1 %688 }
 0x163   : > { %4441 = vst [vmem:[#allocation39_spill] sm:$0xff] %v3358_v34  ;;  %v3362_v46 = vpop.permute.xlu2 %790 }
 0x168   : > { %898 = vrot.lane.b32.xlu0 %v867_v60, %s4402_s29  ;;  %702 = vrot.lane.b32.xlu1 %v671_v19, %s2883_s24  ;;  %v770_v60 = vrot.slane %v3355_v33, 3  ;;  %v577_v19 = vsel %vm544_vm2, %v574_v10, %v576_v24  ;;  %v575_v24 = vsel %vm544_vm2, %v572_v18, %v574_v10  ;;  %v966_v18 = vrot.slane %v3355_v33, 5 }
 0x169   : > { %704 = vrot.lane.b32.xlu2 %v673_v59, %s2883_s24  ;;  %v965_v59 = vsel %vm936_vm6, %v962_v49, %v964_v44 }
 0x16a   : > { %v3373_v30 = vpop.permute.xlu1 %982  ;;  %v3375_v7 = vpop.permute.xlu0 %590  ;;  %v773_v32 = vsel %vm740_vm4, %v770_v60, %v772_v40  ;;  %v771_v40 = vsel %vm740_vm4, %v768_v11, %v770_v60  ;;  %v969_v50 = vsel %vm936_vm6, %v966_v18, %v968_v62 }
 0x16b   : > { %4442 = vst [vmem:[#allocation40_spill] sm:$0xff] %v3373_v30  ;;  %v3377_v5 = vpop.permute.xlu2 %1083  ;;  %v1035_v30 = vrot.slane %v3045_v16, 6 }
 0x16c   : > { %4443 = vst [vmem:[#allocation41_spill] sm:$0xff] %v3377_v5 }
 0x170   : > { %996 = vrot.lane.b32.xlu1 %v965_v59, %s2886_s30  ;;  %608 = vrot.lane.b32.xlu0 %v577_v19, %s2882_s22  ;;  %v868_v59 = vrot.slane %v3355_v33, 4 }
 0x171   : > { %804 = vrot.lane.b32.xlu2 %v773_v32, %s2884_s25 }
 0x172   : > { %v3388_v26 = vpop.permute.xlu0 %884  ;;  %v3390_v13 = vpop.permute.xlu1 %690  ;;  %v871_v11 = vsel %vm838_vm5, %v868_v59, %v870_v53  ;;  %v967_v53 = vsel %vm936_vm6, %v964_v44, %v966_v18  ;;  %v1041_v44 = vrot.slane %v3081_v39, 6  ;;  %v840_v18 = vrot.slane %v3045_v16, 4 }
 0x173   : > { %4444 = vst [vmem:[#allocation42_spill] sm:$0xff] %v3388_v26  ;;  %v3392_v15 = vpop.permute.xlu2 %792 }
 0x178   : > { %706 = vrot.lane.b32.xlu1 %v675_v2, %s2883_s24  ;;  %606 = vrot.lane.b32.xlu0 %v575_v24, %s2882_s22  ;;  %v869_v2 = vsel %vm838_vm5, %v866_v31, %v868_v59  ;;  %v1063_v31 = vrot.slane %v3355_v33, 6  ;;  %v4448_v59 = vrot.slane %v3081_v39, 5 }
 0x179   : > { %802 = vrot.lane.b32.xlu2 %v771_v40, %s2884_s25  ;;  %v1065_v40 = vrot.slane %v524_v55, 6 }
 0x17a   : > { %v3400_v49 = vpop.permute.xlu1 %984  ;;  %v3402_v19 = vpop.permute.xlu0 %592  ;;  %v945_v62 = vsel %vm936_vm6, %v942_v3, %v4448_v59  ;;  %v4451_v59 = vrot.slane %v3095_v47, 6 }
 0x17b   : > { %4445 = vst [vmem:[#allocation43_spill] sm:$0xff] %v3400_v49  ;;  %v3404_v32 = vpop.permute.xlu2 %1085 }
 0x17c   : > { %4446 = vst [vmem:[#allocation44_spill] sm:$0xff] %v3404_v32 }
 0x180   : > { %900 = vrot.lane.b32.xlu1 %v869_v2, %s4402_s29  ;;  %902 = vrot.lane.b32.xlu0 %v871_v11, %s4402_s29  ;;  %v1066_v2 = vsel %vm455_vm0, %v1063_v31, %v1065_v40  ;;  %v4452_v40 = vrot.slane %v3052_v21, 4 }
 0x181   : > { %1000 = vrot.lane.b32.xlu2 %v969_v50, %s2886_s30 }
 0x182   : > { %v3414_v10 = vpop.permute.xlu0 %886  ;;  %v3416_v60 = vpop.permute.xlu1 %692 }
 0x183   : > { %4447 = vst [vmem:[#allocation45_spill] sm:$0xff] %v3414_v10  ;;  %v3418_v24 = vpop.permute.xlu2 %794 }
 0x188   : > { %998 = vrot.lane.b32.xlu1 %v967_v53, %s2886_s30  ;;  %976 = vrot.lane.b32.xlu0 %v945_v62, %s2886_s30  ;;  %v1044_v53 = vsel %vm455_vm0, %v1041_v44, %v4451_v59  ;;  %v843_v62 = vsel %vm838_vm5, %v840_v18, %v4452_v40  ;;  %v940_v59 = vrot.slane %v3052_v21, 5  ;;  %v839_v40 = vrot.slane %v3041_v14, 4 }
 0x189   : > { %1097 = vrot.lane.b32.xlu2 %v1066_v2, %s2887_s12  ;;  %v4453_v2 = vrot.slane %v3331_v54, 6 }
 0x18a   : > { %v3430_v11 = vpop.permute.xlu1 %986  ;;  %v3432_v55 = vpop.permute.xlu0 %594  ;;  %v943_v61 = vsel %vm936_vm6, %v940_v59, %v942_v3  ;;  %v938_v3 = vrot.slane %v3045_v16, 5 }
 0x18b   : > { %4449 = vst [vmem:[#allocation46_spill] sm:$0xff] %v3430_v11  ;;  %v3434_v50 = vpop.permute.xlu2 %1087  ;;  %v1064_v20 = vsel %vm455_vm0, %v4453_v2, %v1063_v31  ;;  %v841_v31 = vsel %vm838_vm5, %v839_v40, %v840_v18  ;;  %v937_v18 = vrot.slane %v3041_v14, 5 }
 0x18c   : > { %4450 = vst [vmem:[#allocation47_spill] sm:$0xff] %v3434_v50  ;;  %v941_v40 = vsel %vm936_vm6, %v938_v3, %v940_v59  ;;  %v1038_v59 = vsel %vm455_vm0, %v1035_v30, %v1037_v57 }
 0x190   : > { %1075 = vrot.lane.b32.xlu1 %v1044_v53, %s2887_s12  ;;  %874 = vrot.lane.b32.xlu0 %v843_v62, %s4402_s29  ;;  %v741_v53 = vrot.slane %v3041_v14, 3 }
 0x191   : > { %1095 = vrot.lane.b32.xlu2 %v1064_v20, %s2887_s12  ;;  %v4455_v20 = vrot.slane %v3045_v16, 3 }
 0x192   : > { %v3450_v23 = vpop.permute.xlu0 %888  ;;  %v3452_v1 = vpop.permute.xlu1 %694 }
 0x193   : > { %4454 = vst [vmem:[#allocation48_spill] sm:$0xff] %v3450_v23  ;;  %v3454_v27 = vpop.permute.xlu2 %796  ;;  %v743_v62 = vsel %vm740_vm4, %v741_v53, %v4455_v20  ;;  %v939_v53 = vsel %vm936_vm6, %v937_v18, %v938_v3 }
 0x198   : > { %974 = vrot.lane.b32.xlu1 %v943_v61, %s2886_s30  ;;  %872 = vrot.lane.b32.xlu0 %v841_v31, %s4402_s29  ;;  %v1039_v61 = vrot.slane %v3064_v29, 6 }
 0x199   : > { %774 = vrot.lane.b32.xlu2 %v743_v62, %s2884_s25 }
 0x19a   : > { %v3467_v2 = vpop.permute.xlu1 %988  ;;  %v3469_v8 = vpop.permute.xlu0 %596  ;;  %v1042_v31 = vsel %vm455_vm0, %v1039_v61, %v1041_v44  ;;  %v1040_v3 = vsel %vm455_vm0, %v1037_v57, %v1039_v61 }
 0x19b   : > { %4456 = vst [vmem:[#allocation49_spill] sm:$0xff] %v3467_v2  ;;  %v3471_v36 = vpop.permute.xlu2 %1089 }
 0x19c   : > { %4457 = vst [vmem:[#allocation50_spill] sm:$0xff] %v3471_v36 }
 0x1a0   : > { %972 = vrot.lane.b32.xlu1 %v941_v40, %s2886_s30  ;;  %970 = vrot.lane.b32.xlu0 %v939_v53, %s2886_s30  ;;  %v1034_v53 = vrot.slane %v3041_v14, 6  ;;  %s4398_s30 = smov 32  }
 0x1a1   : > { %1073 = vrot.lane.b32.xlu2 %v1042_v31, %s2887_s12 }
 0x1a2   : > { %v3482_v20 = vpop.permute.xlu0 %890  ;;  %v697_v62 = vpop.permute.xlu1 %696  ;;  %v1036_v31 = vsel %vm455_vm0, %v1034_v53, %v1035_v30 }
 0x1a3   : > { %v701_v17 = vpop.permute.xlu2 %700 }
 0x1a8   : > { %1069 = vrot.lane.b32.xlu1 %v1038_v59, %s2887_s12 }
 0x1a9   : > { %1071 = vrot.lane.b32.xlu2 %v1040_v3, %s2887_s12 }
 0x1aa   : > { %v3490_v44 = vpop.permute.xlu1 %990  ;;  %v599_v18 = vpop.permute.xlu0 %598 }
 0x1ab   : > { %4458 = vst [vmem:[#allocation51_spill] sm:$0xff] %v3490_v44  ;;  %v799_v40 = vpop.permute.xlu2 %798 }
 0x1b1   : > { %1067 = vrot.lane.b32.xlu2 %v1036_v31, %s2887_s12 }
 0x1b2   : > { %v3495_v5 = vpop.permute.xlu0 %892  ;;  %v601_v16 = vpop.permute.xlu1 %600 }
 0x1b3   : > { %v3497_v28 = vpop.permute.xlu2 %1091  ;;  %v637_v45 = vadd.f32 %v601_v16, %v3225_v12  ;;  %v633_v16 = vadd.f32 %v3402_v19, %v3139_v9 }
 0x1b4   : > { %4459 = vst [vmem:[#allocation52_spill] sm:$0xff] %v3497_v28  ;;  %v636_v28 = vadd.f32 %v599_v18, %v3199_v56 }
 0x1ba   : > { %v895_v59 = vpop.permute.xlu0 %894  ;;  %v699_v49 = vpop.permute.xlu1 %698 }
 0x1bb   : > { %v3499_v57 = vpop.permute.xlu2 %1093 }
 0x1bc   : > { %4460 = vst [vmem:[#allocation53_spill] sm:$0xff] %v3499_v57 }
 0x1c2   : > { %v3501_v61 = vpop.permute.xlu1 %992  ;;  %v603_v3 = vpop.permute.xlu0 %602 }
 0x1c3   : > { %v705_v32 = vpop.permute.xlu2 %704  ;;  %v638_v52 = vadd.f32 %v603_v3, %v3257_v37  ;;  %v735_v37 = vadd.f32 %v699_v49, %v637_v45  ;;  %v4474_v3 = vld [vmem:[#allocation45_spill] sm:$0xff] }
 0x1c5   : > { %v736_v22 = vadd.f32 %v701_v17, %v638_v52  ;;  %v833_v17 = vadd.f32 %v3454_v27, %v735_v37  ;;  %v731_v27 = vadd.f32 %v3390_v13, %v633_v16  ;;  %v4477_v37 = vld [vmem:[#allocation29_spill] sm:$0xff]  ;;  %v4481_v16 = vld [vmem:[#allocation46_spill] sm:$0xff] }
 0x1ca   : > { %v995_v34 = vpop.permute.xlu1 %994  ;;  %v897_v51 = vpop.permute.xlu0 %896 }
 0x1cb   : > { %v805_v14 = vpop.permute.xlu2 %804 }
 0x1d2   : > { %v801_v38 = vpop.permute.xlu0 %800  ;;  %v605_v30 = vpop.permute.xlu1 %604 }
 0x1d3   : > { %v803_v53 = vpop.permute.xlu2 %802  ;;  %v639_v29 = vadd.f32 %v605_v30, %v3289_v0 }
 0x1da   : > { %v899_v31 = vpop.permute.xlu0 %898  ;;  %v703_v11 = vpop.permute.xlu1 %702 }
 0x1db   : > { %v1001_v50 = vpop.permute.xlu2 %1000  ;;  %v737_v21 = vadd.f32 %v703_v11, %v639_v29  ;;  %v634_v29 = vadd.f32 %v3432_v55, %v3159_v25 }
 0x1e2   : > { %v997_v26 = vpop.permute.xlu1 %996  ;;  %v609_v43 = vpop.permute.xlu0 %608 }
 0x1e3   : > { %v1098_v4 = vpop.permute.xlu2 %1097  ;;  %v641_v10 = vadd.f32 %v609_v43, %v3355_v33  ;;  %v635_v43 = vadd.f32 %v3469_v8, %v3179_v42 }
 0x1e5   : > { %v733_v12 = vadd.f32 %v3452_v1, %v635_v43  ;;  %v631_v1 = vadd.f32 %v3341_v63, %v3095_v47  ;;  %v4461_v47 = vld [vmem:[#allocation53_spill] sm:$0xff]  ;;  %v4462_v63 = vld [vmem:[#allocation12_spill] sm:$0xff] }
 0x1e6   : > { %v4476_v43 = vld [vmem:[#allocation49_spill] sm:$0xff] }
 0x1ea   : > { %v707_v2 = vpop.permute.xlu1 %706  ;;  %v607_v36 = vpop.permute.xlu0 %606 }
 0x1eb   : > { %v739_v6 = vadd.f32 %v707_v2, %v641_v10  ;;  %v640_v41 = vadd.f32 %v607_v36, %v3331_v54  ;;  %v1096_v33 = vpop.permute.xlu2 %1095  ;;  %v835_v10 = vadd.f32 %v801_v38, %v737_v21  ;;  %v632_v21 = vadd.f32 %v3375_v7, %v3113_v58  ;;  %v4470_v2 = vld [vmem:[#allocation23_spill] sm:$0xff] }
 0x1ed   : > { %v837_v44 = vadd.f32 %v805_v14, %v739_v6  ;;  %v738_v39 = vadd.f32 %v705_v32, %v640_v41  ;;  %v734_v14 = vadd.f32 %v697_v62, %v636_v28  ;;  %v834_v6 = vadd.f32 %v799_v40, %v736_v22  ;;  %v4471_v62 = vld [vmem:[#allocation11_spill] sm:$0xff] }
 0x1ee   : > { %v933_v42 = vadd.f32 %v899_v31, %v835_v10 }
 0x1ef   : > { %v836_v56 = vadd.f32 %v803_v53, %v738_v39  ;;  %v932_v41 = vadd.f32 %v897_v51, %v834_v6  ;;  %v732_v39 = vadd.f32 %v3416_v60, %v634_v29  ;;  %v832_v28 = vadd.f32 %v3418_v24, %v734_v14  ;;  %v4466_v60 = vld [vmem:[#allocation48_spill] sm:$0xff]  ;;  %v4475_v53 = vld [vmem:[#allocation50_spill] sm:$0xff] }
 0x1f0   : > { %v831_v51 = vadd.f32 %v3392_v15, %v733_v12  ;;  %v4463_v15 = vld [vmem:[#allocation32_spill] sm:$0xff]  ;;  %v4479_v14 = vld [vmem:[#allocation42_spill] sm:$0xff] }
 0x1f1   : > { %v930_v22 = vadd.f32 %v3495_v5, %v832_v28  ;;  %v1030_v58 = vadd.f32 %v995_v34, %v932_v41  ;;  %v830_v8 = vadd.f32 %v3362_v46, %v732_v39  ;;  %v630_v49 = vadd.f32 %v4463_v15, %v4462_v63  ;;  %v4464_v5 = vld [vmem:[#allocation35_spill] sm:$0xff]  ;;  %v4465_v34 = vld [vmem:[#allocation36_spill] sm:$0xff]  ;;  %v4493_v15 = vld [vmem:[#allocation38_spill] sm:$0xff] }
 0x1f2   : > { %v901_v23 = vpop.permute.xlu1 %900  ;;  %v903_v48 = vpop.permute.xlu0 %902  ;;  %v729_v19 = vadd.f32 %v4464_v5, %v631_v1  ;;  %v829_v32 = vadd.f32 %v4465_v34, %v731_v27  ;;  %v4467_v24 = vld [vmem:[#allocation52_spill] sm:$0xff]  ;;  %v4468_v46 = vld [vmem:[#allocation51_spill] sm:$0xff]  ;;  %v4487_v27 = vld [vmem:[#allocation21_spill] sm:$0xff] }
 0x1f3   : > { %v935_v57 = vadd.f32 %v903_v48, %v837_v44  ;;  %v934_v52 = vadd.f32 %v901_v23, %v836_v56  ;;  %v931_v23 = vadd.f32 %v895_v59, %v833_v17  ;;  %v730_v48 = vadd.f32 %v3360_v35, %v632_v21  ;;  %v3529_v54 = vpop.permute.xlu2 %774  ;;  %v4472_v44 = vld [vmem:[#allocation26_spill] sm:$0xff]  ;;  %v4480_v56 = vld [vmem:[#allocation47_spill] sm:$0xff]  ;;  %v4485_v39 = vld [vmem:[#allocation44_spill] sm:$0xff] }
 0x1f4   : > { %v928_v35 = vadd.f32 %v4466_v60, %v830_v8  ;;  %v1127_v11 = vadd.f32 %v4467_v24, %v1030_v58  ;;  %v1028_v55 = vadd.f32 %v4468_v46, %v930_v22  ;;  %v629_v18 = vadd.f32 %v4472_v44, %v4471_v62  ;;  %v4482_v17 = vld [vmem:[#allocation22_spill] sm:$0xff]  ;;  %v4484_v21 = vld [vmem:[#allocation39_spill] sm:$0xff]  ;;  %v4488_v22 = vld [vmem:[#allocation41_spill] sm:$0xff] }
 0x1f5   : > { %v1033_v0 = vadd.f32 %v1001_v50, %v935_v57  ;;  %v1029_v7 = vadd.f32 %v3501_v61, %v931_v23  ;;  %v4469_v50 = vld [vmem:[#allocation10_spill] sm:$0xff]  ;;  %v927_v30 = vadd.f32 %v4474_v3, %v829_v32  ;;  %v728_v10 = vadd.f32 %v4477_v37, %v630_v49  ;;  %v4489_v58 = vld [vmem:[#allocation40_spill] sm:$0xff]  ;;  %v4494_v5 = vld [vmem:[#allocation37_spill] sm:$0xff] }
 0x1f6   : > { %v4473_v57 = vld [vmem:[#allocation30_spill] sm:$0xff]  ;;  %v1026_v12 = vadd.f32 %v4481_v16, %v928_v35  ;;  %v4495_v32 = vld [vmem:[#allocation9_spill] sm:$0xff]  ;;  %v4496_v60 = vld [vmem:[#allocation20_spill] sm:$0xff]  ;;  %v1131_v37 = vlaneseq }
 0x1f7   : > { %v1130_v36 = vadd.f32 %v1098_v4, %v1033_v0  ;;  %v1031_v4 = vadd.f32 %v997_v26, %v933_v42  ;;  %v929_v26 = vadd.f32 %v3482_v20, %v831_v51  ;;  %v628_v20 = vadd.f32 %v4470_v2, %v4469_v50  ;;  %v4478_v0 = vld [vmem:[#allocation24_spill] sm:$0xff]  ;;  %v4483_v42 = vld [vmem:[#allocation25_spill] sm:$0xff]  ;;  %v4499_v2 = vld [vmem:[#allocation31_spill] sm:$0xff] }
 0x1f8   : > { %v828_v61 = vadd.f32 %v4473_v57, %v730_v48  ;;  %v1126_v31 = vadd.f32 %v4475_v53, %v1029_v7  ;;  %v827_v29 = vadd.f32 %v4478_v0, %v729_v19  ;;  %v826_v51 = vadd.f32 %v4487_v27, %v728_v10  ;;  %v4490_v48 = vld [vmem:[#allocation13_spill] sm:$0xff]  ;;  %v4491_v7 = vld [vmem:[#allocation18_spill] sm:$0xff]  ;;  %v4497_v24 = vld [vmem:[#allocation28_spill] sm:$0xff] }
 0x1f9   : > { %1177 = vmatpush.msra.mxu1 %v1130_v36  ;;  %v1128_v13 = vadd.f32 %v4461_v47, %v1031_v4  ;;  %v1125_v36 = vadd.f32 %v4480_v56, %v1028_v55  ;;  %v726_v41 = vadd.f32 %v4482_v17, %v628_v20  ;;  %v4486_v4 = vld [vmem:[#allocation43_spill] sm:$0xff]  ;;  %v1123_v23 = vadd.f32 %v4488_v22, %v1026_v12  ;;  %v4498_v46 = vld [vmem:[#allocation33_spill] sm:$0xff]  ;;  %v4503_v3 = vld [vmem:[#allocation14_spill] sm:$0xff] }
 0x1fa   : > { %v999_v38 = vpop.permute.xlu1 %998  ;;  %v3519_v25 = vpop.permute.xlu0 %976  ;;  %v926_v6 = vadd.f32 %v4479_v14, %v828_v61  ;;  %v627_v35 = vadd.f32 %v4496_v60, %v4495_v32  ;;  %v4500_v62 = vld [vmem:[#allocation15_spill] sm:$0xff]  ;;  %v4502_v61 = vld [vmem:[#allocation8_spill] sm:$0xff]  ;;  %v4504_v53 = vld [vmem:[#allocation17_spill] sm:$0xff]  ;;  %v1132_v12 = vshrl.u32 %v1131_v37, 7  ;;  %v2888_v27 = vmov 1.0  }
 0x1fb   : > { %v1032_v9 = vadd.f32 %v999_v38, %v934_v52  ;;  %v727_v52 = vadd.f32 %v4483_v42, %v629_v18  ;;  %v925_v38 = vadd.f32 %v4484_v21, %v827_v29  ;;  %v1074_v1 = vpop.permute.xlu2 %1073  ;;  %v824_v8 = vadd.f32 %v4490_v48, %v726_v41  ;;  %v4501_v18 = vld [vmem:[#allocation27_spill] sm:$0xff]  ;;  %v4505_v29 = vld [vmem:[#allocation16_spill] sm:$0xff]  ;;  %v1249_v32 = vld [vmem:[%s4379_s3 + $0x8] sm:$0xff] }
 0x1fc   : > { %v4506_v56 = vld [vmem:[#allocation19_spill] sm:$0xff]  ;;  %v1141_v21 = vand.u32 127, %v1131_v37  ;;  %v1134_v22 = vadd.s32 16, %v1132_v12  ;;  %1342 = vmatpush.msra.mxu3 %v1249_v32  ;;  %v2812_v60 = vld [vmem:[%s4378_s2] ss:$0 sm:$0xff] }
 0x1fd   : > { %v1129_v45 = vadd.f32 %v1096_v33, %v1032_v9  ;;  %v1027_v33 = vadd.f32 %v4476_v43, %v929_v26  ;;  %v1025_v9 = vadd.f32 %v4486_v4, %v927_v30  ;;  %v825_v47 = vadd.f32 %v4491_v7, %v727_v52 }
 0x1fe   : > { %v1023_v19 = vadd.f32 %v4494_v5, %v925_v38  ;;  %v922_v44 = vadd.f32 %v4500_v62, %v824_v8  ;;  %v626_v30 = vadd.f32 %v4503_v3, %v4502_v61  ;;  %v1142_v38 = vmul.u32 2, %v1132_v12  ;;  %v1909_v8 = vld [vmem:[%s4381_s5 + $0x28] sm:$0xff] }
 0x1ff   : > { %1178 = vmatpush.msra.mxu1 %v1129_v45  ;;  %v1124_v28 = vadd.f32 %v4485_v39, %v1027_v33  ;;  %v1024_v45 = vadd.f32 %v4489_v58, %v926_v6  ;;  %v1122_v49 = vadd.f32 %v4493_v15, %v1025_v9  ;;  %v1908_v58 = vld [vmem:[%s4381_s5 + $0x20] sm:$0xff] }
 0x200   : > { %v1120_v57 = vadd.f32 %v4501_v18, %v1023_v19  ;;  %vm3582_vm7 = vcmp.eq.s32.totalorder %v1141_v21, %v1142_v38  ;;  %v2889_v19 = vmov 0.0  }
 0x201   : > { %1179 = vmatpush.msra.mxu1 %v1128_v13  ;;  %v4492_v13 = vld [vmem:[#allocation34_spill] sm:$0xff]  ;;  %v1121_v55 = vadd.f32 %v4498_v46, %v1024_v45  ;;  %v1135_v45 = vadd.s32 24, %v1132_v12  ;;  %1227 = vst.msk [vmem:[#allocation2] sm:$0x1f] %vm1226_vm15, %v2889_v19 }
 0x202   : > { %v1076_v40 = vpop.permute.xlu1 %1075  ;;  %v875_v59 = vpop.permute.xlu0 %874  ;;  %v924_v63 = vadd.f32 %v4492_v13, %v826_v51  ;;  %1228 = vst.msk [vmem:[#allocation2 + $0x45] sm:$0x1f] %vm1226_vm15, %v2889_v19  ;;  %v1907_v51 = vld [vmem:[%s4381_s5 + $0x18] sm:$0xff] }
 0x203   : > { %1180 = vmatpush.msra.mxu1 %v1127_v11  ;;  %v923_v11 = vadd.f32 %v4497_v24, %v825_v47  ;;  %v1072_v10 = vpop.permute.xlu2 %1071  ;;  %v1145_v48 = vmul.u32 2, %v1135_v45  ;;  %v1137_v47 = vadd.s32 40, %v1132_v12  ;;  %1943 = vmatpush.msrb.mxu3 %v1907_v51 }
 0x204   : > { %v1022_v20 = vadd.f32 %v4499_v2, %v924_v63  ;;  %v1138_v63 = vadd.s32 48, %v1132_v12 }
 0x205   : > { %1181 = vmatpush.msra.mxu1 %v1126_v31  ;;  %v1021_v50 = vadd.f32 %v3519_v25, %v923_v11  ;;  %v725_v31 = vadd.f32 %v4504_v53, %v627_v35  ;;  %v724_v25 = vadd.f32 %v4505_v29, %v626_v30  ;;  %vm3600_vm10 = vcmp.eq.s32.totalorder %v1141_v21, %v1145_v48 }
 0x206   : > { %v1119_v43 = vadd.f32 %v1076_v40, %v1022_v20  ;;  %v1147_v13 = vmul.u32 2, %v1137_v47  ;;  %v1148_v15 = vmul.u32 2, %v1138_v63 }
 0x207   : > { %1182 = vmatpush.msra.mxu1 %v1125_v36  ;;  %v1118_v14 = vadd.f32 %v1074_v1, %v1021_v50  ;;  %v822_v6 = vadd.f32 %v3529_v54, %v724_v25  ;;  %v823_v36 = vadd.f32 %v4506_v56, %v725_v31  ;;  %v1133_v1 = vadd.s32 8, %v1132_v12 }
 0x208   : > { %vm1155_vm12 = vcmp.eq.s32.totalorder %v1141_v21, %v1147_v13  ;;  %vm1156_vm13 = vcmp.eq.s32.totalorder %v1141_v21, %v1148_v15 }
 0x209   : > { %1183 = vmatpush.msra.mxu1 %v1124_v28  ;;  %v921_v41 = vadd.f32 %v875_v59, %v823_v36  ;;  %v1143_v59 = vmul.u32 2, %v1133_v1 }
 0x20a   : > { %v975_v26 = vpop.permute.xlu1 %974  ;;  %v873_v34 = vpop.permute.xlu0 %872 }
 0x20b   : > { %1184 = vmatpush.msra.mxu1 %v1123_v23  ;;  %v1020_v33 = vadd.f32 %v975_v26, %v922_v44  ;;  %v920_v42 = vadd.f32 %v873_v34, %v822_v6  ;;  %v1068_v4 = vpop.permute.xlu2 %1067  ;;  %vm3588_vm8 = vcmp.eq.s32.totalorder %v1141_v21, %v1143_v59  ;;  %v1144_v23 = vmul.u32 2, %v1134_v22  ;;  %v1248_v34 = vld [vmem:[%s4379_s3] sm:$0xff] }
 0x20c   : > { %v1136_v26 = vadd.s32 32, %v1132_v12  ;;  %1296 = vmatpush.msrb.mxu2 %v1248_v34 }
 0x20d   : > { %1185 = vmatpush.msra.mxu1 %v1122_v49  ;;  %v1117_v16 = vadd.f32 %v1072_v10, %v1020_v33  ;;  %vm3594_vm9 = vcmp.eq.s32.totalorder %v1141_v21, %v1144_v23  ;;  %v1139_v49 = vadd.s32 56, %v1132_v12 }
 0x20e   : > { %v1146_v7 = vmul.u32 2, %v1136_v26  ;;  %v2684_v54 = vsel %vm3594_vm9, 1.0, %v2889_v19 }
 0x20f   : > { %1186 = vmatpush.msra.mxu1 %v1121_v55  ;;  %v1149_v5 = vmul.u32 2, %v1139_v49 }
 0x210   : > { %vm1154_vm11 = vcmp.eq.s32.totalorder %v1141_v21, %v1146_v7 }
 0x211   : > { %1187 = vmatpush.msra.mxu1 %v1120_v57  ;;  %vm1157_vm14 = vcmp.eq.s32.totalorder %v1141_v21, %v1149_v5 }
 0x212   : > { %v973_v0 = vpop.permute.xlu1 %972  ;;  %v971_v17 = vpop.permute.xlu0 %970 }
 0x213   : > { %1188 = vmatpush.msra.mxu1 %v1119_v43  ;;  %v1019_v40 = vadd.f32 %v973_v0, %v921_v41  ;;  %v1018_v52 = vadd.f32 %v971_v17, %v920_v42 }
 0x215   : > { %1189 = vmatpush.msra.mxu1 %v1118_v14  ;;  %v1115_v9 = vadd.f32 %v1068_v4, %v1018_v52 }
 0x217   : > { %1190 = vmatpush.msra.mxu1 %v1117_v16 }
 0x21a   : > { %v1070_v39 = vpop.permute.xlu1 %1069 }
 0x21b   : > { %v1116_v28 = vadd.f32 %v1070_v39, %v1019_v40  ;;  %v1247_v40 = vld [vmem:[#allocation2 + $0x48] sm:$0x3] }
 0x21d   : > { %1191 = vmatpush.msra.mxu1 %v1116_v28 }
 0x21f   : > { %1192 = vmatpush.msra.mxu1 %v1115_v9 }
 0x220   : > { %2690 = vmatmul.msk.f32.vlgmr.msra.gmra.mxu1 %vm3582_vm7, %v2888_v27 }
 0x221   : > { %1977 = vmatpush.msrb.mxu1 %v1908_v58 }
 0x228   : > { %2691 = vmatmul.msk.f32.gmra.mxu1 %vm3588_vm8, %v2888_v27 }
 0x230   : > { %2692 = vmatmul.msk.f32.gmra.mxu1 %vm3594_vm9, %v2888_v27  ;;  %vm2270_vm9 = vcmask 261120  }
 0x238   : > { %2693 = vmatmul.msk.f32.gmra.mxu1 %vm3600_vm10, %v2888_v27 }
 0x240   : > { %2694 = vmatmul.msk.f32.gmra.mxu1 %vm1154_vm11, %v2888_v27  ;;  %vm1676_vm11 = vcmask 1040384  }
 0x248   : > { %2695 = vmatmul.msk.f32.gmra.mxu1 %vm1155_vm12, %v2888_v27  ;;  %vm1844_vm12 = vcmask 523264  }
 0x250   : > { %2696 = vmatmul.msk.f32.gmra.mxu1 %vm1156_vm13, %v2888_v27 }
 0x258   : > { %2697 = vmatmul.msk.f32.gmra.mxu1 %vm1157_vm14, %v2888_v27 }
 0x29d   : > { %v1194_v35 = vpop.f32.mrf.mxu1 }
 0x29e   : > { %v1195_v24 = vadd.f32 %v2812_v60, %v1194_v35 }
 0x2a0   : > { %v1218_v11 = vmax.f32 %v1195_v24, 0.0 }
 0x2a2   : > { %1230 = vst.msk [vmem:[#allocation2 + $0x5] sm:$0xff] %vm1229_vm1, %v1218_v11 }
 0x2a5   : > { %v1197_v46 = vpop.f32.mrf.mxu1 }
 0x2a6   : > { %v1198_v55 = vadd.f32 %v2812_v60, %v1197_v46 }
 0x2a8   : > { %v1219_v50 = vmax.f32 %v1198_v55, 0.0 }
 0x2a9   : > { %v1238_v2 = vld [vmem:[#allocation2] sm:$0xff] }
 0x2aa   : > { %1231 = vst.msk [vmem:[#allocation2 + $0xd] sm:$0xff] %vm1229_vm1, %v1219_v50  ;;  %2698 = vmatmul.msk.f32.vlgmr.msrb.gmra.mxu2 %vm1229_vm1, %v1238_v2  ;;  %2708 = vmatmul.msk.f32.vlgmr.msra.gmra.mxu3 %vm1229_vm1, %v1238_v2 }
 0x2ad   : > { %v1200_v20 = vpop.f32.mrf.mxu1 }
 0x2ae   : > { %v1201_v62 = vadd.f32 %v2812_v60, %v1200_v20 }
 0x2b0   : > { %v1220_v44 = vmax.f32 %v1201_v62, 0.0 }
 0x2b1   : > { %v1239_v18 = vld [vmem:[#allocation2 + $0x8] sm:$0xff] }
 0x2b2   : > { %1232 = vst.msk [vmem:[#allocation2 + $0x15] sm:$0xff] %vm1229_vm1, %v1220_v44  ;;  %2699 = vmatmul.msk.f32.gmra.mxu2 %vm1229_vm1, %v1239_v18  ;;  %2709 = vmatmul.msk.f32.gmra.mxu3 %vm1229_vm1, %v1239_v18 }
 0x2b5   : > { %v1203_v57 = vpop.f32.mrf.mxu1 }
 0x2b6   : > { %v1204_v61 = vadd.f32 %v2812_v60, %v1203_v57 }
 0x2b8   : > { %v1221_v3 = vmax.f32 %v1204_v61, 0.0 }
 0x2b9   : > { %v1240_v30 = vld [vmem:[#allocation2 + $0x10] sm:$0xff] }
 0x2ba   : > { %1233 = vst.msk [vmem:[#allocation2 + $0x1d] sm:$0xff] %vm1229_vm1, %v1221_v3  ;;  %2700 = vmatmul.msk.f32.gmra.mxu2 %vm1229_vm1, %v1240_v30  ;;  %2710 = vmatmul.msk.f32.gmra.mxu3 %vm1229_vm1, %v1240_v30 }
 0x2bd   : > { %v1206_v53 = vpop.f32.mrf.mxu1 }
 0x2be   : > { %v1207_v31 = vadd.f32 %v2812_v60, %v1206_v53 }
 0x2c0   : > { %v1222_v43 = vmax.f32 %v1207_v31, 0.0 }
 0x2c1   : > { %v1241_v33 = vld [vmem:[#allocation2 + $0x18] sm:$0xff] }
 0x2c2   : > { %1234 = vst.msk [vmem:[#allocation2 + $0x25] sm:$0xff] %vm1229_vm1, %v1222_v43  ;;  %2701 = vmatmul.msk.f32.gmra.mxu2 %vm1229_vm1, %v1241_v33  ;;  %2711 = vmatmul.msk.f32.gmra.mxu3 %vm1229_vm1, %v1241_v33 }
 0x2c5   : > { %v1209_v37 = vpop.f32.mrf.mxu1 }
 0x2c6   : > { %v1210_v10 = vadd.f32 %v2812_v60, %v1209_v37 }
 0x2c8   : > { %v1223_v0 = vmax.f32 %v1210_v10, 0.0 }
 0x2c9   : > { %v1242_v29 = vld [vmem:[#allocation2 + $0x20] sm:$0xff] }
 0x2ca   : > { %1235 = vst.msk [vmem:[#allocation2 + $0x2d] sm:$0xff] %vm1229_vm1, %v1223_v0  ;;  %2702 = vmatmul.msk.f32.gmra.mxu2 %vm1229_vm1, %v1242_v29  ;;  %2712 = vmatmul.msk.f32.gmra.mxu3 %vm1229_vm1, %v1242_v29 }
 0x2cd   : > { %v1212_v25 = vpop.f32.mrf.mxu1 }
 0x2ce   : > { %v1213_v14 = vadd.f32 %v2812_v60, %v1212_v25 }
 0x2d0   : > { %v1224_v6 = vmax.f32 %v1213_v14, 0.0 }
 0x2d1   : > { %v1243_v56 = vld [vmem:[#allocation2 + $0x28] sm:$0xff] }
 0x2d2   : > { %2703 = vmatmul.msk.f32.gmra.mxu2 %vm1229_vm1, %v1243_v56  ;;  %2713 = vmatmul.msk.f32.gmra.mxu3 %vm1229_vm1, %v1243_v56  ;;  %1236 = vst.msk [vmem:[#allocation2 + $0x35] sm:$0xff] %vm1229_vm1, %v1224_v6 }
 0x2d5   : > { %v1215_v36 = vpop.f32.mrf.mxu1 }
 0x2d6   : > { %v1216_v16 = vadd.f32 %v2812_v60, %v1215_v36 }
 0x2d8   : > { %v1225_v12 = vmax.f32 %v1216_v16, 0.0 }
 0x2d9   : > { %v1244_v17 = vld [vmem:[#allocation2 + $0x30] sm:$0xff] }
 0x2da   : > { %1237 = vst.msk [vmem:[#allocation2 + $0x3d] sm:$0xff] %vm1229_vm1, %v1225_v12  ;;  %2704 = vmatmul.msk.f32.gmra.mxu2 %vm1229_vm1, %v1244_v17  ;;  %2714 = vmatmul.msk.f32.gmra.mxu3 %vm1229_vm1, %v1244_v17 }
 0x2e1   : > { %v1245_v41 = vld [vmem:[#allocation2 + $0x38] sm:$0xff]  ;;  %v1246_v42 = vld [vmem:[#allocation2 + $0x40] sm:$0xff] }
 0x2e2   : > { %2705 = vmatmul.msk.f32.gmra.mxu2 %vm1229_vm1, %v1245_v41  ;;  %2715 = vmatmul.msk.f32.gmra.mxu3 %vm1229_vm1, %v1245_v41 }
 0x2ea   : > { %2706 = vmatmul.msk.f32.gmra.mxu2 %vm1229_vm1, %v1246_v42  ;;  %2716 = vmatmul.msk.f32.gmra.mxu3 %vm1229_vm1, %v1246_v42 }
 0x2f2   : > { %2717 = vmatmul.msk.f32.gmra.mxu3 %vm1229_vm1, %v1247_v40  ;;  %2707 = vmatmul.msk.f32.gmra.mxu2 %vm1229_vm1, %v1247_v40 }
 0x32d   : > { %v3645_v52 = vpop.f32.mrf.mxu2  ;;  %v1344_v21 = vpop.f32.mrf.mxu3 }
 0x32e   : > { %v1480_v39 = vrot.slane %v3645_v52, 3  ;;  %v1431_v4 = vrot.slane %v3645_v52, 2  ;;  %v1382_v1 = vrot.slane %v3645_v52, 1  ;;  %v1627_v7 = vrot.slane %v3645_v52, 6 }
 0x32f   : > { %v1529_v13 = vrot.slane %v3645_v52, 4  ;;  %v1578_v35 = vrot.slane %v3645_v52, 5  ;;  %v1677_v44 = vrot.slane %v3645_v52, 7 }
 0x335   : > { %v3647_v38 = vpop.f32.mrf.mxu2  ;;  %v3688_v55 = vpop.f32.mrf.mxu3 }
 0x336   : > { %v1481_v28 = vrot.slane %v3647_v38, 3  ;;  %v1432_v9 = vrot.slane %v3647_v38, 2  ;;  %v1383_v27 = vrot.slane %v3647_v38, 1  ;;  %v1628_v45 = vrot.slane %v3647_v38, 6 }
 0x337   : > { %v1530_v26 = vrot.slane %v3647_v38, 4  ;;  %v1579_v60 = vrot.slane %v3647_v38, 5  ;;  %v1678_v20 = vrot.slane %v3647_v38, 7 }
 0x338   : > { %v1482_v59 = vsel %vm740_vm4, %v1480_v39, %v1481_v28  ;;  %v1433_v22 = vsel %vm642_vm3, %v1431_v4, %v1432_v9  ;;  %v1384_v23 = vsel %vm544_vm2, %v1382_v1, %v1383_v27  ;;  %v1629_v63 = vsel %vm455_vm0, %v1627_v7, %v1628_v45 }
 0x339   : > { %1497 = vrot.lane.b32.xlu0 %v1482_v59, %s2887_s12  ;;  %1448 = vrot.lane.b32.xlu2 %v1433_v22, %s4402_s29  ;;  %v1531_v49 = vsel %vm838_vm5, %v1529_v13, %v1530_v26  ;;  %v1580_v46 = vsel %vm936_vm6, %v1578_v35, %v1579_v60  ;;  %v1679_v61 = vsel %vm1676_vm11, %v1677_v44, %v1678_v20 }
 0x33a   : > { %1399 = vrot.lane.b32.xlu1 %v1384_v23, %s2883_s24 }
 0x33d   : > { %v3662_v48 = vpop.f32.mrf.mxu2  ;;  %v3704_v53 = vpop.f32.mrf.mxu3 }
 0x33e   : > { %v1434_v47 = vrot.slane %v3662_v48, 2  ;;  %v1581_v5 = vrot.slane %v3662_v48, 5  ;;  %v1385_v34 = vrot.slane %v3662_v48, 1  ;;  %v1630_v50 = vrot.slane %v3662_v48, 6 }
 0x33f   : > { %v1483_v2 = vrot.slane %v3662_v48, 3  ;;  %v1532_v31 = vrot.slane %v3662_v48, 4  ;;  %v1680_v25 = vrot.slane %v3662_v48, 7 }
 0x340   : > { %v1435_v15 = vsel %vm642_vm3, %v1432_v9, %v1434_v47  ;;  %v1582_v24 = vsel %vm936_vm6, %v1579_v60, %v1581_v5  ;;  %v1386_v11 = vsel %vm544_vm2, %v1383_v27, %v1385_v34  ;;  %v1631_v18 = vsel %vm455_vm0, %v1628_v45, %v1630_v50 }
 0x341   : > { %1644 = vrot.lane.b32.xlu0 %v1629_v63, %s4398_s30  ;;  %1450 = vrot.lane.b32.xlu2 %v1435_v15, %s4402_s29  ;;  %v1484_v57 = vsel %vm740_vm4, %v1481_v28, %v1483_v2  ;;  %v1533_v10 = vsel %vm838_vm5, %v1530_v26, %v1532_v31  ;;  %v1681_v36 = vsel %vm1676_vm11, %v1678_v20, %v1680_v25 }
 0x342   : > { %1546 = vrot.lane.b32.xlu1 %v1531_v49, %s4400_s13 }
 0x345   : > { %v3678_v32 = vpop.f32.mrf.mxu2  ;;  %v3718_v14 = vpop.f32.mrf.mxu3 }
 0x346   : > { %v1583_v3 = vrot.slane %v3678_v32, 5  ;;  %v1387_v30 = vrot.slane %v3678_v32, 1  ;;  %v1485_v0 = vrot.slane %v3678_v32, 3  ;;  %v1632_v12 = vrot.slane %v3678_v32, 6 }
 0x347   : > { %v1436_v41 = vrot.slane %v3678_v32, 2  ;;  %v1682_v9 = vrot.slane %v3678_v32, 7  ;;  %v1534_v1 = vrot.slane %v3678_v32, 4  ;;  %v1746_v27 = vrot.slane %v3718_v14, 1 }
 0x348   : > { %v1584_v43 = vsel %vm936_vm6, %v1581_v5, %v1583_v3  ;;  %v1388_v33 = vsel %vm544_vm2, %v1385_v34, %v1387_v30  ;;  %v1486_v6 = vsel %vm740_vm4, %v1483_v2, %v1485_v0  ;;  %v1633_v42 = vsel %vm455_vm0, %v1630_v50, %v1632_v12 }
 0x349   : > { %1597 = vrot.lane.b32.xlu2 %v1582_v24, %s2892_s14  ;;  %1401 = vrot.lane.b32.xlu0 %v1386_v11, %s2883_s24  ;;  %v1437_v39 = vsel %vm642_vm3, %v1434_v47, %v1436_v41  ;;  %v1683_v59 = vsel %vm1676_vm11, %v1680_v25, %v1682_v9  ;;  %v1535_v23 = vsel %vm838_vm5, %v1532_v31, %v1534_v1 }
 0x34a   : > { %1595 = vrot.lane.b32.xlu1 %v1580_v46, %s2892_s14 }
 0x34d   : > { %v3693_v62 = vpop.f32.mrf.mxu2  ;;  %v3733_v21 = vpop.f32.mrf.mxu3 }
 0x34e   : > { %v1487_v29 = vrot.slane %v3693_v62, 3  ;;  %v1585_v17 = vrot.slane %v3693_v62, 5  ;;  %v1748_v4 = vrot.slane %v3733_v21, 1  ;;  %v1634_v26 = vrot.slane %v3693_v62, 6 }
 0x34f   : > { %v1389_v47 = vrot.slane %v3693_v62, 1  ;;  %v1438_v13 = vrot.slane %v3693_v62, 2  ;;  %v1536_v2 = vrot.slane %v3693_v62, 4 }
 0x350   : > { %v1488_v56 = vsel %vm740_vm4, %v1485_v0, %v1487_v29  ;;  %v1586_v40 = vsel %vm936_vm6, %v1583_v3, %v1585_v17  ;;  %v1749_v22 = vsel %vm544_vm2, %v1746_v27, %v1748_v4  ;;  %v1635_v63 = vsel %vm455_vm0, %v1632_v12, %v1634_v26 }
 0x351   : > { %1646 = vrot.lane.b32.xlu2 %v1631_v18, %s4398_s30  ;;  %1499 = vrot.lane.b32.xlu0 %v1484_v57, %s2887_s12  ;;  %v1390_v49 = vsel %vm544_vm2, %v1387_v30, %v1389_v47  ;;  %v1439_v11 = vsel %vm642_vm3, %v1436_v41, %v1438_v13  ;;  %v1537_v57 = vsel %vm838_vm5, %v1534_v1, %v1536_v2  ;;  %v1684_v30 = vrot.slane %v3693_v62, 7 }
 0x352   : > { %1694 = vrot.lane.b32.xlu1 %v1679_v61, %s2893_s15 }
 0x355   : > { %v3709_v37 = vpop.f32.mrf.mxu2  ;;  %v3780_v18 = vpop.f32.mrf.mxu3 }
 0x356   : > { %v1440_v7 = vrot.slane %v3709_v37, 2  ;;  %v1489_v34 = vrot.slane %v3709_v37, 3  ;;  %v1391_v60 = vrot.slane %v3709_v37, 1  ;;  %v1587_v46 = vrot.slane %v3709_v37, 5 }
 0x357   : > { %v1538_v50 = vrot.slane %v3709_v37, 4  ;;  %v1750_v61 = vrot.slane %v3780_v18, 1  ;;  %v1636_v3 = vrot.slane %v3709_v37, 6  ;;  %v1686_v25 = vrot.slane %v3709_v37, 7 }
 0x358   : > { %v1441_v15 = vsel %vm642_vm3, %v1438_v13, %v1440_v7  ;;  %v1490_v35 = vsel %vm740_vm4, %v1487_v29, %v1489_v34  ;;  %v1392_v24 = vsel %vm544_vm2, %v1389_v47, %v1391_v60  ;;  %v1588_v20 = vsel %vm936_vm6, %v1585_v17, %v1587_v46 }
 0x359   : > { %1599 = vrot.lane.b32.xlu2 %v1584_v43, %s2892_s14  ;;  %1403 = vrot.lane.b32.xlu0 %v1388_v33, %s2883_s24  ;;  %v1539_v44 = vsel %vm838_vm5, %v1536_v2, %v1538_v50  ;;  %v1751_v31 = vsel %vm544_vm2, %v1748_v4, %v1750_v61  ;;  %v1637_v43 = vsel %vm455_vm0, %v1634_v26, %v1636_v3 }
 0x35a   : > { %1548 = vrot.lane.b32.xlu1 %v1533_v10, %s4400_s13  ;;  %v1685_v33 = vsel %vm1676_vm11, %v1682_v9, %v1684_v30  ;;  %v1687_v17 = vsel %vm1676_vm11, %v1684_v30, %v1686_v25 }
 0x35d   : > { %v3725_v16 = vpop.f32.mrf.mxu2 }
 0x35e   : > { %v1393_v0 = vrot.slane %v3725_v16, 1  ;;  %v1540_v26 = vrot.slane %v3725_v16, 4  ;;  %v1589_v47 = vrot.slane %v3725_v16, 5 }
 0x361   : > { %1501 = vrot.lane.b32.xlu0 %v1486_v6, %s2887_s12  ;;  %1503 = vrot.lane.b32.xlu2 %v1488_v56, %s2887_s12  ;;  %v1491_v6 = vrot.slane %v3725_v16, 3  ;;  %v3801_v56 = vpop.f32.mrf.mxu3 }
 0x362   : > { %1696 = vrot.lane.b32.xlu1 %v1681_v36, %s2893_s15  ;;  %v1394_v36 = vsel %vm544_vm2, %v1391_v60, %v1393_v0  ;;  %v1752_v13 = vrot.slane %v3801_v56, 1 }
 0x363   : > { %v1492_v4 = vsel %vm740_vm4, %v1489_v34, %v1491_v6 }
 0x365   : > { %v3741_v28 = vpop.f32.mrf.mxu2 }
 0x366   : > { %v1493_v29 = vrot.slane %v3741_v28, 3 }
 0x368   : > { %v1494_v12 = vsel %vm740_vm4, %v1491_v6, %v1493_v29  ;;  %v1753_v6 = vsel %vm544_vm2, %v1750_v61, %v1752_v13 }
 0x369   : > { %1648 = vrot.lane.b32.xlu0 %v1633_v42, %s4398_s30  ;;  %1601 = vrot.lane.b32.xlu2 %v1586_v40, %s2892_s14  ;;  %v1640_v42 = vrot.slane %v3741_v28, 6  ;;  %v1442_v40 = vrot.slane %v3725_v16, 2  ;;  %v3820_v1 = vpop.f32.mrf.mxu3 }
 0x36a   : > { %1452 = vrot.lane.b32.xlu1 %v1437_v39, %s4402_s29  ;;  %v1638_v39 = vrot.slane %v3725_v16, 6  ;;  %v1803_v34 = vrot.slane %v3820_v1, 2 }
 0x36c   : > { %v1641_v9 = vsel %vm455_vm0, %v1638_v39, %v1640_v42 }
 0x36d   : > { %v3755_v45 = vpop.f32.mrf.mxu2 }
 0x371   : > { %1698 = vrot.lane.b32.xlu0 %v1683_v59, %s2893_s15  ;;  %1764 = vrot.lane.b32.xlu2 %v1749_v22, %s2883_s24  ;;  %v1443_v59 = vsel %vm642_vm3, %v1440_v7, %v1442_v40  ;;  %v1541_v7 = vsel %vm838_vm5, %v1538_v50, %v1540_v26 }
 0x372   : > { %1550 = vrot.lane.b32.xlu1 %v1535_v23, %s4400_s13  ;;  %v1754_v23 = vrot.slane %v3820_v1, 1 }
 0x375   : > { %v1325_v5 = vpop.f32.mrf.mxu2 }
 0x379   : > { %1650 = vrot.lane.b32.xlu0 %v1635_v63, %s4398_s30  ;;  %1456 = vrot.lane.b32.xlu2 %v1441_v15, %s4402_s29  ;;  %v1755_v63 = vsel %vm544_vm2, %v1752_v13, %v1754_v23  ;;  %v1590_v15 = vsel %vm936_vm6, %v1587_v46, %v1589_v47  ;;  %v1639_v46 = vsel %vm455_vm0, %v1636_v3, %v1638_v39  ;;  %v1446_v3 = vrot.slane %v3755_v45, 2 }
 0x37a   : > { %1405 = vrot.lane.b32.xlu1 %v1390_v49, %s2883_s24 }
 0x381   : > { %1505 = vrot.lane.b32.xlu2 %v1490_v35, %s2887_s12  ;;  %1407 = vrot.lane.b32.xlu0 %v1392_v24, %s2883_s24  ;;  %v1688_v24 = vrot.slane %v3725_v16, 7 }
 0x382   : > { %1454 = vrot.lane.b32.xlu1 %v1439_v11, %s4402_s29  ;;  %v1801_v11 = vrot.slane %v3801_v56, 2 }
 0x384   : > { %v1804_v2 = vsel %vm642_vm3, %v1801_v11, %v1803_v34 }
 0x389   : > { %1603 = vrot.lane.b32.xlu2 %v1588_v20, %s2892_s14  ;;  %1554 = vrot.lane.b32.xlu0 %v1539_v44, %s4400_s13  ;;  %v1689_v20 = vsel %vm1676_vm11, %v1686_v25, %v1688_v24 }
 0x38a   : > { %1552 = vrot.lane.b32.xlu1 %v1537_v57, %s4400_s13 }
 0x391   : > { %1766 = vrot.lane.b32.xlu2 %v1751_v31, %s2883_s24  ;;  %1652 = vrot.lane.b32.xlu0 %v1637_v43, %s4398_s30  ;;  %v1799_v43 = vrot.slane %v3780_v18, 2 }
 0x392   : > { %1700 = vrot.lane.b32.xlu1 %v1685_v33, %s2893_s15  ;;  %v1444_v33 = vrot.slane %v3741_v28, 2 }
 0x393   : > { %v1449_v10 = vpop.permute.xlu2 %1448 }
 0x394   : > { %v1447_v25 = vsel %vm642_vm3, %v1444_v33, %v1446_v3 }
 0x399   : > { %1409 = vrot.lane.b32.xlu0 %v1394_v36, %s2883_s24  ;;  %1509 = vrot.lane.b32.xlu2 %v1494_v12, %s2887_s12 }
 0x39a   : > { %1702 = vrot.lane.b32.xlu1 %v1687_v17, %s2893_s15 }
 0x39b   : > { %v1451_v41 = vpop.permute.xlu2 %1450 }
 0x3a1   : > { %1507 = vrot.lane.b32.xlu0 %v1492_v4, %s2887_s12  ;;  %1656 = vrot.lane.b32.xlu2 %v1641_v9, %s4398_s30  ;;  %v1495_v4 = vrot.slane %v3755_v45, 3  ;;  %v1397_v9 = vrot.slane %v3755_v45, 1 }
 0x3a2   : > { %1458 = vrot.lane.b32.xlu1 %v1443_v59, %s4402_s29 }
 0x3a3   : > { %v3828_v22 = vpop.permute.xlu2 %1597 }
 0x3a9   : > { %1556 = vrot.lane.b32.xlu0 %v1541_v7, %s4400_s13  ;;  %1770 = vrot.lane.b32.xlu2 %v1755_v63, %s2883_s24  ;;  %v1395_v7 = vrot.slane %v3741_v28, 1  ;;  %v1496_v63 = vsel %vm740_vm4, %v1493_v29, %v1495_v4  ;;  %v1544_v29 = vrot.slane %v3755_v45, 4 }
 0x3aa   : > { %1605 = vrot.lane.b32.xlu1 %v1590_v15, %s2892_s14 }
 0x3ab   : > { %v1498_v49 = vpop.permute.xlu0 %1497  ;;  %v3846_v5 = vpop.permute.xlu2 %1646  ;;  %v1398_v15 = vsel %vm544_vm2, %v1395_v7, %v1397_v9 }
 0x3ac   : > { %v1400_v60 = vpop.permute.xlu1 %1399 }
 0x3ad   : > { %v1423_v35 = vadd.f32 %v1400_v60, %v3645_v52 }
 0x3af   : > { %v1472_v50 = vadd.f32 %v1449_v10, %v1423_v35  ;;  %v1802_v10 = vsel %vm642_vm3, %v1799_v43, %v1801_v11  ;;  %v1593_v11 = vrot.slane %v3755_v45, 5 }
 0x3b1   : > { %1654 = vrot.lane.b32.xlu0 %v1639_v46, %s4398_s30  ;;  %1819 = vrot.lane.b32.xlu2 %v1804_v2, %s4402_s29  ;;  %v1521_v52 = vadd.f32 %v1498_v49, %v1472_v50  ;;  %v1396_v49 = vsel %vm544_vm2, %v1393_v0, %v1395_v7  ;;  %v1591_v46 = vrot.slane %v3741_v28, 5  ;;  %v1542_v0 = vrot.slane %v3741_v28, 4 }
 0x3b2   : > { %1704 = vrot.lane.b32.xlu1 %v1689_v20, %s2893_s15 }
 0x3b3   : > { %v1645_v44 = vpop.permute.xlu0 %1644  ;;  %v3862_v57 = vpop.permute.xlu2 %1599  ;;  %v1594_v2 = vsel %vm936_vm6, %v1591_v46, %v1593_v11  ;;  %v1545_v20 = vsel %vm838_vm5, %v1542_v0, %v1544_v29 }
 0x3b4   : > { %v1547_v30 = vpop.permute.xlu1 %1546 }
 0x3b5   : > { %v1570_v31 = vadd.f32 %v1547_v30, %v1521_v52  ;;  %v1445_v52 = vsel %vm642_vm3, %v1442_v40, %v1444_v33 }
 0x3b9   : > { %1817 = vrot.lane.b32.xlu0 %v1802_v10, %s4402_s29  ;;  %1462 = vrot.lane.b32.xlu2 %v1447_v25, %s4402_s29  ;;  %v1692_v10 = vrot.slane %v3755_v45, 7 }
 0x3ba   : > { %1768 = vrot.lane.b32.xlu1 %v1753_v6, %s2883_s24  ;;  %v1690_v6 = vrot.slane %v3741_v28, 7 }
 0x3bb   : > { %v1402_v36 = vpop.permute.xlu0 %1401  ;;  %v3877_v12 = vpop.permute.xlu2 %1503 }
 0x3bc   : > { %v1596_v17 = vpop.permute.xlu1 %1595  ;;  %v1424_v39 = vadd.f32 %v1402_v36, %v3647_v38  ;;  %v1693_v33 = vsel %vm1676_vm11, %v1690_v6, %v1692_v10 }
 0x3bd   : > { %v1619_v59 = vadd.f32 %v1596_v17, %v1570_v31  ;;  %v1642_v31 = vrot.slane %v3755_v45, 6  ;;  %v3919_v17 = vpop.f32.mrf.mxu3 }
 0x3be   : > { %v1473_v61 = vadd.f32 %v1451_v41, %v1424_v39  ;;  %v1543_v39 = vsel %vm838_vm5, %v1540_v26, %v1542_v0  ;;  %v1805_v9 = vrot.slane %v3919_v17, 2  ;;  %v1797_v0 = vrot.slane %v3733_v21, 2 }
 0x3bf   : > { %v1668_v13 = vadd.f32 %v1645_v44, %v1619_v59  ;;  %v1643_v40 = vsel %vm455_vm0, %v1640_v42, %v1642_v31  ;;  %v1756_v42 = vrot.slane %v3919_v17, 1 }
 0x3c0   : > { %v1800_v31 = vsel %vm642_vm3, %v1797_v0, %v1799_v43  ;;  %v1743_v43 = vrot.slane %v3688_v55, 1 }
 0x3c1   : > { %1511 = vrot.lane.b32.xlu2 %v1496_v63, %s2887_s12  ;;  %1413 = vrot.lane.b32.xlu0 %v1398_v15, %s2883_s24  ;;  %v1757_v26 = vsel %vm544_vm2, %v1754_v23, %v1756_v42  ;;  %s2600_s12 = scalar_lea.hbm %s4387_s11, %s2976_s21 }
 0x3c2   : > { %1411 = vrot.lane.b32.xlu1 %v1396_v49, %s2883_s24 }
 0x3c3   : > { %v1500_v38 = vpop.permute.xlu0 %1499  ;;  %v3893_v60 = vpop.permute.xlu2 %1601 }
 0x3c4   : > { %v1695_v41 = vpop.permute.xlu1 %1694  ;;  %v1522_v35 = vadd.f32 %v1500_v38, %v1473_v61  ;;  %v1806_v61 = vsel %vm642_vm3, %v1803_v34, %v1805_v9 }
 0x3c5   : > { %v3897_v50 = vadd.f32 %v1695_v41, %v1668_v13  ;;  %v1592_v13 = vsel %vm936_vm6, %v1589_v47, %v1591_v46  ;;  %v1691_v47 = vsel %vm1676_vm11, %v1688_v24, %v1690_v6 }
 0x3c9   : > { %1609 = vrot.lane.b32.xlu2 %v1594_v2, %s2892_s14  ;;  %1560 = vrot.lane.b32.xlu0 %v1545_v20, %s4400_s13 }
 0x3ca   : > { %1460 = vrot.lane.b32.xlu1 %v1445_v52, %s4402_s29  ;;  %v1795_v52 = vrot.slane %v3718_v14, 2 }
 0x3cb   : > { %v1404_v44 = vpop.permute.xlu0 %1403  ;;  %v3909_v30 = vpop.permute.xlu2 %1764 }
 0x3cc   : > { %v1549_v3 = vpop.permute.xlu1 %1548  ;;  %v1425_v63 = vadd.f32 %v1404_v44, %v3662_v48  ;;  %v1744_v44 = vrot.slane %v3704_v53, 1  ;;  %v1798_v24 = vsel %vm642_vm3, %v1795_v52, %v1797_v0 }
 0x3cd   : > { %v1571_v25 = vadd.f32 %v1549_v3, %v1522_v35 }
 0x3cf   : > { %v1620_v36 = vadd.f32 %v3828_v22, %v1571_v25  ;;  %v1747_v25 = vsel %vm544_vm2, %v1744_v44, %v1746_v27 }
 0x3d1   : > { %1658 = vrot.lane.b32.xlu2 %v1643_v40, %s4398_s30  ;;  %1708 = vrot.lane.b32.xlu0 %v1693_v33, %s2893_s15  ;;  %v1669_v45 = vadd.f32 %v3846_v5, %v1620_v36  ;;  %v1370_v5 = vpop.f32.mrf.mxu3  ;;  %s4516_s30 = smov 64  }
 0x3d2   : > { %1558 = vrot.lane.b32.xlu1 %v1543_v39, %s4400_s13  ;;  %v1758_v23 = vrot.slane %v1370_v5, 1  ;;  %v1807_v38 = vrot.slane %v1370_v5, 2  ;;  %s4517_s13 = smov 32  }
 0x3d3   : > { %v1502_v22 = vpop.permute.xlu0 %1501  ;;  %v1457_v4 = vpop.permute.xlu2 %1456 }
 0x3d4   : > { %v1697_v59 = vpop.permute.xlu1 %1696  ;;  %v1759_v11 = vsel %vm544_vm2, %v1756_v42, %v1758_v23  ;;  %v1808_v29 = vsel %vm642_vm3, %v1805_v9, %v1807_v38  ;;  %v1745_v42 = vsel %vm544_vm2, %v1743_v43, %v1744_v44 }
 0x3d5   : > { %v3930_v7 = vadd.f32 %v1697_v59, %v1669_v45  ;;  %v1792_v45 = vrot.slane %v3688_v55, 2 }
 0x3d9   : > { %1772 = vrot.lane.b32.xlu2 %v1757_v26, %s2883_s24  ;;  %1821 = vrot.lane.b32.xlu0 %v1806_v61, %s4402_s29 }
 0x3da   : > { %1607 = vrot.lane.b32.xlu1 %v1592_v13, %s2892_s14  ;;  %s377_s14 = sand.u32 1, %s2872_s18  }
 0x3db   : > { %v1649_v15 = vpop.permute.xlu0 %1648  ;;  %v1506_v49 = vpop.permute.xlu2 %1505  ;;  %s378_s16 = scalar_lea.vmem [#allocation5], %s377_s14 }
 0x3dc   : > { %v1453_v41 = vpop.permute.xlu1 %1452  ;;  %s2602_s22 = sshll.u32 %s378_s16, 4  ;;  %s2603_s22 = int_to_ptr.vmem [resolvable:$true] %s2602_s22 }
 0x3dd   : > { %v1474_v35 = vadd.f32 %v1453_v41, %v1425_v63 }
 0x3df   : > { %v1523_v34 = vadd.f32 %v1502_v22, %v1474_v35 }
 0x3e1   : > { %1774 = vrot.lane.b32.xlu2 %v1759_v11, %s2883_s24  ;;  %1823 = vrot.lane.b32.xlu0 %v1808_v29, %s4402_s29 }
 0x3e2   : > { %1706 = vrot.lane.b32.xlu1 %v1691_v47, %s2893_s15 }
 0x3e3   : > { %v1699_v48 = vpop.permute.xlu0 %1698  ;;  %v1604_v46 = vpop.permute.xlu2 %1603 }
 0x3e4   : > { %v1551_v2 = vpop.permute.xlu1 %1550 }
 0x3e5   : > { %v1572_v20 = vadd.f32 %v1551_v2, %v1523_v34 }
 0x3e7   : > { %v1621_v3 = vadd.f32 %v3862_v57, %v1572_v20  ;;  %v1793_v57 = vrot.slane %v3704_v53, 2 }
 0x3e9   : > { %v1670_v10 = vadd.f32 %v1649_v15, %v1621_v3  ;;  %1813 = vrot.lane.b32.xlu2 %v1798_v24, %s4402_s29  ;;  %1815 = vrot.lane.b32.xlu0 %v1800_v31, %s4402_s29  ;;  %v1794_v22 = vsel %vm642_vm3, %v1792_v45, %v1793_v57  ;;  %v1796_v9 = vsel %vm642_vm3, %v1793_v57, %v1795_v52 }
 0x3ea   : > { %1762 = vrot.lane.b32.xlu1 %v1747_v25, %s2883_s24 }
 0x3eb   : > { %v1720_v6 = vadd.f32 %v1699_v48, %v1670_v10  ;;  %v1651_v36 = vpop.permute.xlu0 %1650  ;;  %v1767_v39 = vpop.permute.xlu2 %1766 }
 0x3ec   : > { %v1406_v40 = vpop.permute.xlu1 %1405 }
 0x3ed   : > { %v1728_v33 = vadd.f32 %v1720_v6, %v3718_v14  ;;  %v1426_v14 = vadd.f32 %v1406_v40, %v3678_v32 }
 0x3ef   : > { %v3972_v27 = vadd.f32 %v3909_v30, %v1728_v33 }
 0x3f1   : > { %1809 = vrot.lane.b32.xlu2 %v1794_v22, %s4402_s29  ;;  %1760 = vrot.lane.b32.xlu0 %v1745_v42, %s2883_s24  ;;  %s2838_s24 = scalar_lea.hbm %s4387_s11, 2 }
 0x3f2   : > { %1811 = vrot.lane.b32.xlu1 %v1796_v9, %s4402_s29  ;;  %s4515_s29 = smov 96  }
 0x3f3   : > { %v1408_v59 = vpop.permute.xlu0 %1407  ;;  %v1510_v13 = vpop.permute.xlu2 %1509 }
 0x3f4   : > { %v1455_v26 = vpop.permute.xlu1 %1454  ;;  %v1427_v61 = vadd.f32 %v1408_v59, %v3693_v62 }
 0x3f5   : > { %v1475_v30 = vadd.f32 %v1455_v26, %v1426_v14 }
 0x3f6   : > { %v1476_v5 = vadd.f32 %v1457_v4, %v1427_v61 }
 0x3f7   : > { %v1524_v63 = vadd.f32 %v3877_v12, %v1475_v30 }
 0x3f8   : > { %v1525_v15 = vadd.f32 %v1506_v49, %v1476_v5 }
 0x3fb   : > { %v1555_v23 = vpop.permute.xlu0 %1554  ;;  %v1657_v29 = vpop.permute.xlu2 %1656 }
 0x3fc   : > { %v1553_v38 = vpop.permute.xlu1 %1552  ;;  %v1574_v41 = vadd.f32 %v1555_v23, %v1525_v15 }
 0x3fd   : > { %v1573_v35 = vadd.f32 %v1553_v38, %v1524_v63 }
 0x3fe   : > { %v1623_v34 = vadd.f32 %v1604_v46, %v1574_v41 }
 0x3ff   : > { %v1622_v11 = vadd.f32 %v3893_v60, %v1573_v35 }
 0x401   : > { %v1671_v47 = vadd.f32 %v1651_v36, %v1622_v11 }
 0x403   : > { %v1653_v32 = vpop.permute.xlu0 %1652  ;;  %v1771_v20 = vpop.permute.xlu2 %1770 }
 0x404   : > { %v1701_v48 = vpop.permute.xlu1 %1700  ;;  %v1672_v0 = vadd.f32 %v1653_v32, %v1623_v34 }
 0x405   : > { %v1721_v2 = vadd.f32 %v1701_v48, %v1671_v47 }
 0x407   : > { %v1729_v62 = vadd.f32 %v1721_v2, %v3733_v21 }
 0x409   : > { %v3985_v4 = vadd.f32 %v1767_v39, %v1729_v62 }
 0x40b   : > { %v1410_v12 = vpop.permute.xlu0 %1409  ;;  %v1820_v24 = vpop.permute.xlu2 %1819 }
 0x40c   : > { %v1703_v49 = vpop.permute.xlu1 %1702  ;;  %v1428_v14 = vadd.f32 %v1410_v12, %v3709_v37 }
 0x40d   : > { %v1722_v52 = vadd.f32 %v1703_v49, %v1672_v0 }
 0x413   : > { %v1508_v44 = vpop.permute.xlu0 %1507  ;;  %v1463_v60 = vpop.permute.xlu2 %1462 }
 0x414   : > { %v1459_v3 = vpop.permute.xlu1 %1458 }
 0x415   : > { %v1477_v26 = vadd.f32 %v1459_v3, %v1428_v14 }
 0x417   : > { %v1526_v15 = vadd.f32 %v1508_v44, %v1477_v26 }
 0x41b   : > { %v1557_v46 = vpop.permute.xlu0 %1556  ;;  %v1512_v6 = vpop.permute.xlu2 %1511 }
 0x41c   : > { %v1606_v31 = vpop.permute.xlu1 %1605  ;;  %v1575_v38 = vadd.f32 %v1557_v46, %v1526_v15 }
 0x41e   : > { %v1624_v11 = vadd.f32 %v1606_v31, %v1575_v38  ;;  %v1730_v31 = vadd.f32 %v1722_v52, %v3780_v18  ;;  %v1726_v18 = vadd.f32 %v3897_v50, %v3688_v55  ;;  %v4010_v55 = vsel %vm3588_vm8, 1.0, %v2889_v19 }
 0x41f   : > { %v2685_v50 = vsel %vm3600_vm10, 1.0, %v2889_v19  ;;  %vm1893_vm8 = vcmask 130048   ;;  %vm2300_vm10 = vcmask 256000  }
 0x420   : > { %2301 = vst.msk [vmem:[#allocation4] sm:$0x7] %vm2300_vm10, %v2889_v19 }
 0x421   : > { %2302 = vst.msk [vmem:[#allocation4 + $0x13] sm:$0x7] %vm2300_vm10, %v2889_v19 }
 0x423   : > { %v1655_v10 = vpop.permute.xlu0 %1654  ;;  %v1610_v40 = vpop.permute.xlu2 %1609 }
 0x424   : > { %v1705_v25 = vpop.permute.xlu1 %1704  ;;  %v1673_v0 = vadd.f32 %v1655_v10, %v1624_v11 }
 0x42b   : > { %v1818_v36 = vpop.permute.xlu0 %1817  ;;  %v1659_v42 = vpop.permute.xlu2 %1658 }
 0x42c   : > { %v1769_v57 = vpop.permute.xlu1 %1768 }
 0x433   : > { %v1414_v33 = vpop.permute.xlu0 %1413  ;;  %v1773_v41 = vpop.permute.xlu2 %1772 }
 0x434   : > { %v1412_v21 = vpop.permute.xlu1 %1411  ;;  %v1430_v39 = vadd.f32 %v1414_v33, %v3741_v28  ;;  %v1788_v33 = vadd.f32 %v1769_v57, %v1730_v31 }
 0x435   : > { %v1429_v61 = vadd.f32 %v1412_v21, %v3725_v16  ;;  %v1723_v16 = vadd.f32 %v1705_v25, %v1673_v0 }
 0x436   : > { %v1479_v43 = vadd.f32 %v1463_v60, %v1430_v39 }
 0x437   : > { %v1731_v46 = vadd.f32 %v1723_v16, %v3801_v56  ;;  %v1727_v56 = vadd.f32 %v3930_v7, %v3704_v53  ;;  %v4003_v53 = vsel %vm3582_vm7, 1.0, %v2889_v19  ;;  %vm1890_vm7 = vcmask 126976   ;;  %v1904_v7 = vld [vmem:[%s4381_s5] sm:$0xff] }
 0x438   : > { %v1528_v9 = vadd.f32 %v1512_v6, %v1479_v43  ;;  %v1837_v43 = vadd.f32 %v1818_v36, %v1788_v33  ;;  %1891 = vst.msk [vmem:[#allocation3] sm:$0x1f] %vm1890_vm7, %v2889_v19  ;;  %1944 = vmatpush.msrb.mxu3 %v1904_v7 }
 0x439   : > { %v1789_v10 = vadd.f32 %v1771_v20, %v1731_v46  ;;  %1892 = vst.msk [vmem:[#allocation3 + $0x25] sm:$0x1f] %vm1890_vm7, %v2889_v19  ;;  %v2314_v19 = vld [vmem:[%s4383_s7 + $0x30] sm:$0xff] }
 0x43b   : > { %v1561_v45 = vpop.permute.xlu0 %1560  ;;  %v1775_v12 = vpop.permute.xlu2 %1774  ;;  %v1838_v39 = vadd.f32 %v1820_v24, %v1789_v10 }
 0x43c   : > { %v1461_v22 = vpop.permute.xlu1 %1460  ;;  %v1577_v59 = vadd.f32 %v1561_v45, %v1528_v9  ;;  %v2813_v9 = vld [vmem:[%s4380_s4] ss:$0 sm:$0xff] }
 0x43d   : > { %v1478_v23 = vadd.f32 %v1461_v22, %v1429_v61 }
 0x43e   : > { %v1626_v5 = vadd.f32 %v1610_v40, %v1577_v59 }
 0x43f   : > { %v1527_v28 = vadd.f32 %v1510_v13, %v1478_v23 }
 0x440   : > { %v1675_v35 = vadd.f32 %v1659_v42, %v1626_v5 }
 0x443   : > { %v1709_v30 = vpop.permute.xlu0 %1708  ;;  %v1814_v21 = vpop.permute.xlu2 %1813 }
 0x444   : > { %v1559_v63 = vpop.permute.xlu1 %1558  ;;  %v1725_v34 = vadd.f32 %v1709_v30, %v1675_v35 }
 0x445   : > { %v1576_v47 = vadd.f32 %v1559_v63, %v1527_v28 }
 0x446   : > { %v1733_v2 = vadd.f32 %v1725_v34, %v3919_v17 }
 0x448   : > { %v1791_v49 = vadd.f32 %v1775_v12, %v1733_v2 }
 0x44b   : > { %v1822_v32 = vpop.permute.xlu0 %1821  ;;  %v1810_v42 = vpop.permute.xlu2 %1809 }
 0x44c   : > { %v1608_v48 = vpop.permute.xlu1 %1607 }
 0x44d   : > { %v1625_v37 = vadd.f32 %v1608_v48, %v1576_v47  ;;  %v1903_v48 = vld [vmem:[#allocation3 + $0x28] sm:$0x3] }
 0x44f   : > { %v1674_v62 = vadd.f32 %v1657_v29, %v1625_v37 }
 0x453   : > { %v1824_v3 = vpop.permute.xlu0 %1823 }
 0x454   : > { %v1707_v44 = vpop.permute.xlu1 %1706  ;;  %v1840_v60 = vadd.f32 %v1824_v3, %v1791_v49 }
 0x455   : > { %v1724_v6 = vadd.f32 %v1707_v44, %v1674_v62 }
 0x456   : > { %1865 = vmatpush.msra.mxu2 %v1840_v60 }
 0x457   : > { %v1732_v13 = vadd.f32 %v1724_v6, %v3820_v1  ;;  %v1835_v1 = vadd.f32 %v1814_v21, %v3972_v27  ;;  %v1905_v27 = vld [vmem:[%s4381_s5 + $0x8] sm:$0xff] }
 0x458   : > { %1978 = vmatpush.msrb.mxu1 %v1905_v27 }
 0x459   : > { %v1790_v40 = vadd.f32 %v1773_v41, %v1732_v13 }
 0x45b   : > { %v1816_v17 = vpop.permute.xlu0 %1815  ;;  %v1839_v29 = vadd.f32 %v1822_v32, %v1790_v40 }
 0x45c   : > { %v1763_v25 = vpop.permute.xlu1 %1762  ;;  %v1836_v45 = vadd.f32 %v1816_v17, %v3985_v4  ;;  %v1906_v4 = vld [vmem:[%s4381_s5 + $0x10] sm:$0xff] }
 0x45d   : > { %1866 = vmatpush.msra.mxu2 %v1839_v29  ;;  %v1785_v20 = vadd.f32 %v1763_v25, %v1727_v56 }
 0x45f   : > { %1867 = vmatpush.msra.mxu2 %v1838_v39 }
 0x461   : > { %1868 = vmatpush.msra.mxu2 %v1837_v43 }
 0x463   : > { %1869 = vmatpush.msra.mxu2 %v1836_v45  ;;  %v1761_v52 = vpop.permute.xlu0 %1760 }
 0x464   : > { %v1812_v57 = vpop.permute.xlu1 %1811  ;;  %v1784_v22 = vadd.f32 %v1761_v52, %v1726_v18 }
 0x465   : > { %v1834_v24 = vadd.f32 %v1812_v57, %v1785_v20  ;;  %1870 = vmatpush.msra.mxu2 %v1835_v1 }
 0x466   : > { %v1833_v36 = vadd.f32 %v1810_v42, %v1784_v22 }
 0x467   : > { %1871 = vmatpush.msra.mxu2 %v1834_v24 }
 0x469   : > { %1872 = vmatpush.msra.mxu2 %v1833_v36 }
 0x46a   : > { %2718 = vmatmul.msk.f32.vlgmr.msra.gmra.mxu2 %vm1844_vm12, %v4003_v53 }
 0x46b   : > { %2011 = vmatpush.msrb.mxu2 %v1909_v8 }
 0x46d   : > { %2012 = vmatpush.msrb.mxu2 %v1906_v4 }
 0x472   : > { %2719 = vmatmul.msk.f32.gmra.mxu2 %vm1844_vm12, %v4010_v55 }
 0x47a   : > { %2720 = vmatmul.msk.f32.gmra.mxu2 %vm1844_vm12, %v2684_v54 }
 0x482   : > { %2721 = vmatmul.msk.f32.gmra.mxu2 %vm1844_vm12, %v2685_v50 }
 0x4ed   : > { %v1874_v14 = vpop.f32.mrf.mxu2 }
 0x4ee   : > { %v1875_v59 = vadd.f32 %v2813_v9, %v1874_v14 }
 0x4f0   : > { %v1886_v26 = vmax.f32 %v1875_v59, 0.0 }
 0x4f2   : > { %1894 = vst.msk [vmem:[#allocation3 + $0x5] sm:$0xff] %vm1893_vm8, %v1886_v26 }
 0x4f5   : > { %v1877_v61 = vpop.f32.mrf.mxu2 }
 0x4f6   : > { %v1878_v30 = vadd.f32 %v2813_v9, %v1877_v61 }
 0x4f8   : > { %v1887_v5 = vmax.f32 %v1878_v30, 0.0 }
 0x4f9   : > { %v1898_v63 = vld [vmem:[#allocation3] sm:$0xff] }
 0x4fa   : > { %1895 = vst.msk [vmem:[#allocation3 + $0xd] sm:$0xff] %vm1893_vm8, %v1887_v5  ;;  %2722 = vmatmul.msk.f32.vlgmr.msrb.gmra.mxu3 %vm1893_vm8, %v1898_v63  ;;  %2728 = vmatmul.msk.f32.vlgmr.msrb.gmra.mxu1 %vm1893_vm8, %v1898_v63 }
 0x4fb   : > { %2734 = vmatmul.msk.f32.vlgmr.msrb.gmra.mxu2 %vm1893_vm8, %v1898_v63 }
 0x4fd   : > { %v1880_v15 = vpop.f32.mrf.mxu2 }
 0x4fe   : > { %v1881_v23 = vadd.f32 %v2813_v9, %v1880_v15 }
 0x500   : > { %v1888_v38 = vmax.f32 %v1881_v23, 0.0 }
 0x501   : > { %v1899_v41 = vld [vmem:[#allocation3 + $0x8] sm:$0xff] }
 0x502   : > { %1896 = vst.msk [vmem:[#allocation3 + $0x15] sm:$0xff] %vm1893_vm8, %v1888_v38  ;;  %2723 = vmatmul.msk.f32.gmra.mxu3 %vm1893_vm8, %v1899_v41  ;;  %2729 = vmatmul.msk.f32.gmra.mxu1 %vm1893_vm8, %v1899_v41 }
 0x503   : > { %2735 = vmatmul.msk.f32.gmra.mxu2 %vm1893_vm8, %v1899_v41 }
 0x505   : > { %v1883_v35 = vpop.f32.mrf.mxu2 }
 0x506   : > { %v1884_v28 = vadd.f32 %v2813_v9, %v1883_v35 }
 0x508   : > { %v1889_v34 = vmax.f32 %v1884_v28, 0.0 }
 0x509   : > { %v1900_v11 = vld [vmem:[#allocation3 + $0x10] sm:$0xff] }
 0x50a   : > { %1897 = vst.msk [vmem:[#allocation3 + $0x1d] sm:$0xff] %vm1893_vm8, %v1889_v34  ;;  %2724 = vmatmul.msk.f32.gmra.mxu3 %vm1893_vm8, %v1900_v11  ;;  %2730 = vmatmul.msk.f32.gmra.mxu1 %vm1893_vm8, %v1900_v11 }
 0x50b   : > { %2736 = vmatmul.msk.f32.gmra.mxu2 %vm1893_vm8, %v1900_v11 }
 0x511   : > { %v1901_v47 = vld [vmem:[#allocation3 + $0x18] sm:$0xff]  ;;  %v1902_v32 = vld [vmem:[#allocation3 + $0x20] sm:$0xff] }
 0x512   : > { %2725 = vmatmul.msk.f32.gmra.mxu3 %vm1893_vm8, %v1901_v47  ;;  %2731 = vmatmul.msk.f32.gmra.mxu1 %vm1893_vm8, %v1901_v47 }
 0x513   : > { %2737 = vmatmul.msk.f32.gmra.mxu2 %vm1893_vm8, %v1901_v47 }
 0x51a   : > { %2726 = vmatmul.msk.f32.gmra.mxu3 %vm1893_vm8, %v1902_v32  ;;  %2732 = vmatmul.msk.f32.gmra.mxu1 %vm1893_vm8, %v1902_v32 }
 0x51b   : > { %2738 = vmatmul.msk.f32.gmra.mxu2 %vm1893_vm8, %v1902_v32 }
 0x522   : > { %2727 = vmatmul.msk.f32.gmra.mxu3 %vm1893_vm8, %v1903_v48  ;;  %2733 = vmatmul.msk.f32.gmra.mxu1 %vm1893_vm8, %v1903_v48 }
 0x523   : > { %2739 = vmatmul.msk.f32.gmra.mxu2 %vm1893_vm8, %v1903_v48 }
 0x577   : > { %v4067_v0 = vpop.f32.mrf.mxu1 }
 0x578   : > { %v2116_v16 = vrot.slane %v4067_v0, 4  ;;  %v2133_v12 = vrot.slane %v4067_v0, 5  ;;  %v2158_v31 = vrot.slane %v4067_v0, 6 }
 0x57d   : > { %v4069_v37 = vpop.f32.mrf.mxu3 }
 0x57e   : > { %v2014_v2 = vpop.f32.mrf.mxu2  ;;  %v2036_v1 = vrot.slane %v4069_v37, 1  ;;  %v2061_v8 = vrot.slane %v4069_v37, 2  ;;  %v2086_v63 = vrot.slane %v4069_v37, 3 }
 0x57f   : > { %v4071_v62 = vpop.f32.mrf.mxu1 }
 0x580   : > { %v2117_v49 = vrot.slane %v4071_v62, 4  ;;  %v2134_v3 = vrot.slane %v4071_v62, 5  ;;  %v2159_v6 = vrot.slane %v4071_v62, 6  ;;  %v2184_v56 = vrot.slane %v4071_v62, 7 }
 0x582   : > { %v2135_v44 = vsel %vm936_vm6, %v2133_v12, %v2134_v3  ;;  %v4081_v60 = vsel %vm838_vm5, %v2116_v16, %v2117_v49  ;;  %v2160_v33 = vsel %vm455_vm0, %v2158_v31, %v2159_v6 }
 0x583   : > { %2142 = vrot.lane.b32.xlu0 %v2135_v44, %s4515_s29 }
 0x585   : > { %v4084_v46 = vpop.f32.mrf.mxu3 }
 0x586   : > { %v2037_v39 = vrot.slane %v4084_v46, 1  ;;  %v2062_v54 = vrot.slane %v4084_v46, 2  ;;  %v4134_v14 = vpop.f32.mrf.mxu2  ;;  %v2087_v61 = vrot.slane %v4084_v46, 3 }
 0x587   : > { %v4087_v13 = vpop.f32.mrf.mxu1 }
 0x588   : > { %v2119_v40 = vrot.slane %v4087_v13, 4  ;;  %v2161_v10 = vrot.slane %v4087_v13, 6  ;;  %v2186_v25 = vrot.slane %v4087_v13, 7  ;;  %v2038_v57 = vsel %vm544_vm2, %v2036_v1, %v2037_v39 }
 0x589   : > { %v2063_v4 = vsel %vm642_vm3, %v2061_v8, %v2062_v54  ;;  %v2088_v38 = vsel %vm740_vm4, %v2086_v63, %v2087_v61  ;;  %v2136_v28 = vrot.slane %v4087_v13, 5 }
 0x58a   : > { %v2162_v21 = vsel %vm455_vm0, %v2159_v6, %v2161_v10  ;;  %v4097_v17 = vsel %vm838_vm5, %v2117_v49, %v2119_v40  ;;  %v2187_v20 = vsel %vm1676_vm11, %v2184_v56, %v2186_v25 }
 0x58b   : > { %2167 = vrot.lane.b32.xlu0 %v2160_v33, %s4516_s30  ;;  %2169 = vrot.lane.b32.xlu1 %v2162_v21, %s4516_s30  ;;  %v2137_v48 = vsel %vm936_vm6, %v2134_v3, %v2136_v28 }
 0x58d   : > { %v4101_v29 = vpop.f32.mrf.mxu3 }
 0x58e   : > { %v2064_v24 = vrot.slane %v4101_v29, 2  ;;  %v2089_v51 = vrot.slane %v4101_v29, 3  ;;  %v4145_v34 = vpop.f32.mrf.mxu2  ;;  %v2039_v16 = vrot.slane %v4101_v29, 1 }
 0x58f   : > { %v1989_v43 = vpop.f32.mrf.mxu1 }
 0x590   : > { %v2121_v45 = vrot.slane %v1989_v43, 4  ;;  %v2188_v18 = vrot.slane %v1989_v43, 7  ;;  %v2065_v7 = vsel %vm642_vm3, %v2062_v54, %v2064_v24  ;;  %v2138_v5 = vrot.slane %v1989_v43, 5 }
 0x591   : > { %v2090_v15 = vsel %vm740_vm4, %v2087_v61, %v2089_v51  ;;  %v2163_v11 = vrot.slane %v1989_v43, 6  ;;  %v2040_v3 = vsel %vm544_vm2, %v2037_v39, %v2039_v16  ;;  %v2183_v43 = vrot.slane %v4067_v0, 7 }
 0x592   : > { %v2189_v52 = vsel %vm1676_vm11, %v2186_v25, %v2188_v18  ;;  %v4115_v22 = vsel %vm838_vm5, %v2119_v40, %v2121_v45  ;;  %v2139_v47 = vsel %vm936_vm6, %v2136_v28, %v2138_v5 }
 0x593   : > { %2194 = vrot.lane.b32.xlu1 %v2187_v20, %s4517_s13  ;;  %2196 = vrot.lane.b32.xlu2 %v2189_v52, %s4517_s13  ;;  %v2164_v49 = vsel %vm455_vm0, %v2161_v10, %v2163_v11  ;;  %v2185_v20 = vsel %vm1676_vm11, %v2183_v43, %v2184_v56 }
 0x594   : > { %2045 = vrot.lane.b32.xlu0 %v2038_v57, %s4515_s29 }
 0x595   : > { %v4118_v42 = vpop.f32.mrf.mxu3 }
 0x596   : > { %v2091_v36 = vrot.slane %v4118_v42, 3  ;;  %v4156_v12 = vpop.f32.mrf.mxu2  ;;  %v2041_v6 = vrot.slane %v4118_v42, 1  ;;  %v2066_v33 = vrot.slane %v4118_v42, 2 }
 0x597   : > { %v1992_v50 = vpop.f32.mrf.mxu1  ;;  %v2220_v0 = vrot.slane %v4156_v12, 1 }
 0x598   : > { %v2123_v58 = vrot.slane %v1992_v50, 4  ;;  %v2092_v27 = vsel %vm740_vm4, %v2089_v51, %v2091_v36  ;;  %v2140_v26 = vrot.slane %v1992_v50, 5  ;;  %v2165_v35 = vrot.slane %v1992_v50, 6 }
 0x599   : > { %v2190_v2 = vrot.slane %v1992_v50, 7  ;;  %v2042_v13 = vsel %vm544_vm2, %v2039_v16, %v2041_v6  ;;  %v2245_v51 = vrot.slane %v4156_v12, 2 }
 0x59a   : > { %v4131_v9 = vsel %vm838_vm5, %v2121_v45, %v2123_v58  ;;  %v2141_v23 = vsel %vm936_vm6, %v2138_v5, %v2140_v26  ;;  %v2166_v32 = vsel %vm455_vm0, %v2163_v11, %v2165_v35  ;;  %v2067_v45 = vsel %vm642_vm3, %v2064_v24, %v2066_v33 }
 0x59b   : > { %2072 = vrot.lane.b32.xlu1 %v2065_v7, %s4516_s30  ;;  %2099 = vrot.lane.b32.xlu2 %v2092_v27, %s4517_s13  ;;  %v2191_v44 = vsel %vm1676_vm11, %v2188_v18, %v2190_v2  ;;  %v2218_v24 = vrot.slane %v4145_v34, 1  ;;  %v2243_v58 = vrot.slane %v4145_v34, 2 }
 0x59c   : > { %2070 = vrot.lane.b32.xlu0 %v2063_v4, %s4516_s30  ;;  %v2217_v4 = vrot.slane %v4134_v14, 1 }
 0x59d   : > { %v1958_v59 = vpop.f32.mrf.mxu3  ;;  %v2221_v62 = vsel %vm544_vm2, %v2218_v24, %v2220_v0  ;;  %v2246_v27 = vsel %vm642_vm3, %v2243_v58, %v2245_v51 }
 0x59e   : > { %v2068_v31 = vrot.slane %v1958_v59, 2  ;;  %v2043_v40 = vrot.slane %v1958_v59, 1  ;;  %v4170_v21 = vpop.f32.mrf.mxu2  ;;  %v2093_v39 = vrot.slane %v1958_v59, 3  ;;  %v2242_v59 = vrot.slane %v4134_v14, 2 }
 0x59f   : > { %v1995_v30 = vpop.f32.mrf.mxu1  ;;  %v2222_v52 = vrot.slane %v4170_v21, 1  ;;  %v2247_v56 = vrot.slane %v4170_v21, 2  ;;  %v2219_v61 = vsel %vm544_vm2, %v2217_v4, %v2218_v24 }
 0x5a0   : > { %v2069_v10 = vsel %vm642_vm3, %v2066_v33, %v2068_v31  ;;  %v2044_v25 = vsel %vm544_vm2, %v2041_v6, %v2043_v40  ;;  %v2094_v18 = vsel %vm740_vm4, %v2091_v36, %v2093_v39  ;;  %v2244_v26 = vsel %vm642_vm3, %v2242_v59, %v2243_v58 }
 0x5a1   : > { %v2223_v36 = vsel %vm544_vm2, %v2220_v0, %v2222_v52  ;;  %v2248_v8 = vsel %vm642_vm3, %v2245_v51, %v2247_v56 }
 0x5a3   : > { %2097 = vrot.lane.b32.xlu1 %v2090_v15, %s4517_s13  ;;  %2148 = vrot.lane.b32.xlu2 %v2141_v23, %s4515_s29 }
 0x5a4   : > { %2095 = vrot.lane.b32.xlu0 %v2088_v38, %s4517_s13 }
 0x5a5   : > { %v1961_v41 = vpop.f32.mrf.mxu3 }
 0x5a6   : > { %v2028_v1 = vpop.f32.mrf.mxu2 }
 0x5a7   : > { %v2224_v57 = vrot.slane %v2028_v1, 1  ;;  %v2249_v50 = vrot.slane %v2028_v1, 2 }
 0x5a9   : > { %v2225_v54 = vsel %vm544_vm2, %v2222_v52, %v2224_v57  ;;  %v2250_v7 = vsel %vm642_vm3, %v2247_v56, %v2249_v50 }
 0x5ab   : > { %2146 = vrot.lane.b32.xlu1 %v2139_v47, %s4515_s29  ;;  %2173 = vrot.lane.b32.xlu2 %v2166_v32, %s4516_s30 }
 0x5ac   : > { %2144 = vrot.lane.b32.xlu0 %v2137_v48, %s4515_s29 }
 0x5b3   : > { %2171 = vrot.lane.b32.xlu1 %v2164_v49, %s4516_s30  ;;  %2198 = vrot.lane.b32.xlu2 %v2191_v44, %s4517_s13 }
 0x5b4   : > { %2047 = vrot.lane.b32.xlu0 %v2040_v3, %s4515_s29 }
 0x5bb   : > { %2049 = vrot.lane.b32.xlu1 %v2042_v13, %s4515_s29  ;;  %2076 = vrot.lane.b32.xlu2 %v2069_v10, %s4516_s30 }
 0x5bc   : > { %2051 = vrot.lane.b32.xlu0 %v2044_v25, %s4515_s29 }
 0x5c3   : > { %2074 = vrot.lane.b32.xlu1 %v2067_v45, %s4516_s30  ;;  %2101 = vrot.lane.b32.xlu2 %v2094_v18, %s4517_s13 }
 0x5c4   : > { %2192 = vrot.lane.b32.xlu0 %v2185_v20, %s4517_s13  ;;  %s2592_s13 = scalar_lea.sflag [#allocation6], %s377_s14 }
 0x5cb   : > { %2230 = vrot.lane.b32.xlu1 %v2223_v36, %s4515_s29  ;;  %2232 = vrot.lane.b32.xlu2 %v2225_v54, %s4515_s29 }
 0x5cc   : > { %2228 = vrot.lane.b32.xlu0 %v2221_v62, %s4515_s29 }
 0x5d3   : > { %2255 = vrot.lane.b32.xlu1 %v2248_v8, %s4516_s30  ;;  %2257 = vrot.lane.b32.xlu2 %v2250_v7, %s4516_s30 }
 0x5d4   : > { %2253 = vrot.lane.b32.xlu0 %v2246_v27, %s4516_s30 }
 0x5db   : > { %2251 = vrot.lane.b32.xlu1 %v2244_v26, %s4516_s30  ;;  %2226 = vrot.lane.b32.xlu2 %v2219_v61, %s4515_s29  ;;  %s2604_s29 = sshll.u32 %s2600_s12, 4  ;;  %s2605_s29 = int_to_ptr.hbm [resolvable:$true] %s2604_s29 }
 0x5dc   : > { %s2832_s25 = sshra.s32 %s2605_s29, 4  ;;  %s2833_s25 = int_to_ptr.hbm [resolvable:$true] %s2832_s25 }
 0x5dd   : > { %s2834_s1 = scalar_lea.hbm %s2833_s25, 1  ;;  %p2839_p0 = scmp.lt.s32.totalorder %s2833_s25, %s4387_s11 }
 0x5de   : > { %p2835_p11 = scmp.ne.s32.totalorder %s2833_s25, %s2834_s1  ;;  %p2840_p1 = scmp.lt.s32.totalorder %s2838_s24, %s2834_s1 }
 0x5e0   : > { %p2836_p12 = pnand %p2835_p11, %p2993_p5  ;;  %p2841_p2 = por %p2840_p1, %p2839_p0 }
 0x5e2   : > { %p2837_p13 = pneg %p2836_p12 }
 0x5e4   : > { %p2842_p3 = pnand %p2841_p2, %p2837_p13 }
 0x5ed   : > { %v2197_v30 = vpop.permute.xlu2 %2196 }
 0x5f5   : > { %v2143_v5 = vpop.permute.xlu0 %2142  ;;  %v2100_v63 = vpop.permute.xlu2 %2099 }
 0x5fd   : > { %v2168_v15 = vpop.permute.xlu0 %2167  ;;  %v2170_v23 = vpop.permute.xlu1 %2169 }
 0x5fe   : > { %v2149_v38 = vpop.permute.xlu2 %2148 }
 0x605   : > { %v2195_v41 = vpop.permute.xlu1 %2194 }
 0x606   : > { %v2046_v35 = vpop.permute.xlu0 %2045  ;;  %v2174_v11 = vpop.permute.xlu2 %2173 }
 0x607   : > { %v2057_v32 = vadd.f32 %v2046_v35, %v4069_v37 }
 0x60d   : > { %v2073_v28 = vpop.permute.xlu1 %2072 }
 0x60e   : > { %v2071_v47 = vpop.permute.xlu0 %2070  ;;  %v2199_v44 = vpop.permute.xlu2 %2198 }
 0x60f   : > { %v2082_v48 = vadd.f32 %v2071_v47, %v2057_v32 }
 0x615   : > { %v2098_v2 = vpop.permute.xlu1 %2097 }
 0x616   : > { %v2096_v16 = vpop.permute.xlu0 %2095  ;;  %v2077_v13 = vpop.permute.xlu2 %2076 }
 0x617   : > { %v2107_v49 = vadd.f32 %v2096_v16, %v2082_v48 }
 0x619   : > { %v2129_v3 = vadd.f32 %v4081_v60, %v2107_v49 }
 0x61b   : > { %v2154_v6 = vadd.f32 %v2143_v5, %v2129_v3  ;;  %v2313_v3 = vld [vmem:[%s4383_s7 + $0x28] sm:$0xff] }
 0x61d   : > { %v2147_v31 = vpop.permute.xlu1 %2146  ;;  %v2179_v40 = vadd.f32 %v2168_v15, %v2154_v6  ;;  %v2308_v6 = vld [vmem:[%s4383_s7] sm:$0xff] }
 0x61e   : > { %v2145_v33 = vpop.permute.xlu0 %2144  ;;  %v2102_v18 = vpop.permute.xlu2 %2101 }
 0x625   : > { %v2172_v10 = vpop.permute.xlu1 %2171 }
 0x626   : > { %v2048_v25 = vpop.permute.xlu0 %2047  ;;  %v2233_v56 = vpop.permute.xlu2 %2232 }
 0x627   : > { %v2058_v39 = vadd.f32 %v2048_v25, %v4084_v46 }
 0x629   : > { %v2083_v43 = vadd.f32 %v2073_v28, %v2058_v39  ;;  %v2315_v39 = vld [vmem:[%s4383_s7 + $0x38] sm:$0xff] }
 0x62b   : > { %v2108_v45 = vadd.f32 %v2098_v2, %v2083_v43 }
 0x62d   : > { %v2130_v37 = vadd.f32 %v4097_v17, %v2108_v45  ;;  %v2050_v1 = vpop.permute.xlu1 %2049  ;;  %v2320_v17 = vld [vmem:[%s4383_s7 + $0x60] sm:$0xff]  ;;  %v2311_v45 = vld [vmem:[%s4383_s7 + $0x18] sm:$0xff] }
 0x62e   : > { %v2052_v20 = vpop.permute.xlu0 %2051  ;;  %v2059_v36 = vadd.f32 %v2050_v1, %v4101_v29  ;;  %2346 = vmatpush.msrb.mxu0 %v2320_v17  ;;  %v2258_v5 = vpop.permute.xlu2 %2257 }
 0x62f   : > { %v2060_v52 = vadd.f32 %v2052_v20, %v4118_v42  ;;  %v2155_v57 = vadd.f32 %v2145_v33, %v2130_v37  ;;  %v2316_v42 = vld [vmem:[%s4383_s7 + $0x40] sm:$0xff] }
 0x630   : > { %2347 = vmatpush.msrb.mxu0 %v2316_v42  ;;  %v2814_v33 = vld [vmem:[%s4382_s6] ss:$0 sm:$0xff] }
 0x631   : > { %v2085_v60 = vadd.f32 %v2077_v13, %v2060_v52  ;;  %v2180_v0 = vadd.f32 %v2170_v23, %v2155_v57  ;;  %v2323_v13 = vld [vmem:[%s4383_s7 + $0x78] sm:$0xff] }
 0x633   : > { %v2110_v24 = vadd.f32 %v2102_v18, %v2085_v60  ;;  %v2205_v15 = vadd.f32 %v2195_v41, %v2180_v0 }
 0x635   : > { %v2132_v54 = vadd.f32 %v4131_v9, %v2110_v24  ;;  %v2075_v62 = vpop.permute.xlu1 %2074 }
 0x636   : > { %v2084_v46 = vadd.f32 %v2075_v62, %v2059_v36  ;;  %v2193_v50 = vpop.permute.xlu0 %2192  ;;  %v2227_v16 = vpop.permute.xlu2 %2226 }
 0x637   : > { %v2157_v51 = vadd.f32 %v2149_v38, %v2132_v54  ;;  %v2204_v35 = vadd.f32 %v2193_v50, %v2179_v40  ;;  %v2310_v40 = vld [vmem:[%s4383_s7 + $0x10] sm:$0xff] }
 0x638   : > { %v2109_v58 = vadd.f32 %v2100_v63, %v2084_v46 }
 0x639   : > { %v2182_v8 = vadd.f32 %v2174_v11, %v2157_v51 }
 0x63a   : > { %v2131_v7 = vadd.f32 %v4115_v22, %v2109_v58  ;;  %v2209_v22 = vadd.f32 %v2205_v15, %v4145_v34  ;;  %v2321_v34 = vld [vmem:[%s4383_s7 + $0x68] sm:$0xff] }
 0x63b   : > { %v2207_v29 = vadd.f32 %v2199_v44, %v2182_v8  ;;  %2372 = vmatpush.msra.mxu1 %v2321_v34  ;;  %v2312_v44 = vld [vmem:[%s4383_s7 + $0x20] sm:$0xff] }
 0x63c   : > { %v2156_v9 = vadd.f32 %v2147_v31, %v2131_v7  ;;  %2348 = vmatpush.msrb.mxu0 %v2312_v44  ;;  %v2309_v31 = vld [vmem:[%s4383_s7 + $0x8] sm:$0xff] }
 0x63d   : > { %v2231_v27 = vpop.permute.xlu1 %2230  ;;  %v2211_v4 = vadd.f32 %v2207_v29, %v4170_v21  ;;  %v2208_v21 = vadd.f32 %v2204_v35, %v4134_v14  ;;  %v2322_v14 = vld [vmem:[%s4383_s7 + $0x70] sm:$0xff] }
 0x63e   : > { %v2181_v59 = vadd.f32 %v2172_v10, %v2156_v9  ;;  %v2229_v26 = vpop.permute.xlu0 %2228  ;;  %2349 = vmatpush.msrb.mxu0 %v2308_v6  ;;  %v2319_v10 = vld [vmem:[%s4383_s7 + $0x58] sm:$0xff] }
 0x63f   : > { %v2241_v61 = vadd.f32 %v2233_v56, %v2211_v4  ;;  %v2239_v47 = vadd.f32 %v2229_v26, %v2209_v22 }
 0x640   : > { %v2206_v63 = vadd.f32 %v2197_v30, %v2181_v59  ;;  %v2238_v30 = vadd.f32 %v2227_v16, %v2208_v21  ;;  %2424 = vmatpush.msra.mxu0 %v2323_v13 }
 0x641   : > { %v2266_v23 = vadd.f32 %v2258_v5, %v2241_v61 }
 0x642   : > { %v2210_v38 = vadd.f32 %v2206_v63, %v4156_v12  ;;  %v2317_v12 = vld [vmem:[%s4383_s7 + $0x48] sm:$0xff]  ;;  %2425 = vmatpush.msra.mxu0 %v2319_v10 }
 0x643   : > { %2287 = vmatpush.msra.mxu3 %v2266_v23  ;;  %2373 = vmatpush.msra.mxu1 %v2317_v12 }
 0x644   : > { %v2240_v28 = vadd.f32 %v2231_v27, %v2210_v38  ;;  %2426 = vmatpush.msra.mxu0 %v2315_v39 }
 0x645   : > { %v2256_v11 = vpop.permute.xlu1 %2255  ;;  %2374 = vmatpush.msra.mxu1 %v2313_v3 }
 0x646   : > { %v2265_v32 = vadd.f32 %v2256_v11, %v2240_v28  ;;  %v2254_v48 = vpop.permute.xlu0 %2253  ;;  %2427 = vmatpush.msra.mxu0 %v2311_v45 }
 0x647   : > { %v2264_v2 = vadd.f32 %v2254_v48, %v2239_v47  ;;  %2375 = vmatpush.msra.mxu1 %v2309_v31 }
 0x648   : > { %2288 = vmatpush.msra.mxu3 %v2265_v32 }
 0x64a   : > { %2289 = vmatpush.msra.mxu3 %v2264_v2 }
 0x64d   : > { %v2252_v41 = vpop.permute.xlu1 %2251 }
 0x64e   : > { %v2263_v49 = vadd.f32 %v2252_v41, %v2238_v30 }
 0x650   : > { %2290 = vmatpush.msra.mxu3 %v2263_v49 }
 0x651   : > { %2740 = vmatmul.msk.f32.vlgmr.msra.gmra.mxu3 %vm2270_vm9, %v4003_v53 }
 0x652   : > { %2398 = vmatpush.msrb.mxu3 %v2322_v14 }
 0x659   : > { %2741 = vmatmul.msk.f32.gmra.mxu3 %vm2270_vm9, %v4010_v55  ;;  %v2318_v55 = vld [vmem:[%s4383_s7 + $0x50] sm:$0xff] }
 0x65a   : > { %2399 = vmatpush.msrb.mxu3 %v2318_v55 }
 0x65c   : > { %2400 = vmatpush.msrb.mxu3 %v2314_v19 }
 0x65e   : > { %2401 = vmatpush.msrb.mxu3 %v2310_v40 }
 0x6d4   : > { %v2292_v25 = vpop.f32.mrf.mxu3 }
 0x6d5   : > { %v2293_v43 = vadd.f32 %v2814_v33, %v2292_v25 }
 0x6d7   : > { %v2298_v18 = vmax.f32 %v2293_v43, 0.0 }
 0x6d9   : > { %2303 = vst.msk [vmem:[#allocation4 + $0x3] sm:$0xff] %vm2270_vm9, %v2298_v18 }
 0x6dc   : > { %v2295_v37 = vpop.f32.mrf.mxu3 }
 0x6dd   : > { %v2296_v1 = vadd.f32 %v2814_v33, %v2295_v37 }
 0x6df   : > { %v2299_v20 = vmax.f32 %v2296_v1, 0.0 }
 0x6e0   : > { %v2305_v52 = vld [vmem:[#allocation4] sm:$0xff] }
 0x6e1   : > { %2304 = vst.msk [vmem:[#allocation4 + $0xb] sm:$0xff] %vm2270_vm9, %v2299_v20  ;;  %2742 = vmatmul.msk.f32.vlgmr.msrb.gmra.mxu0 %vm2270_vm9, %v2305_v52  ;;  %2745 = vmatmul.msk.f32.vlgmr.msra.gmra.mxu1 %vm2270_vm9, %v2305_v52 }
 0x6e2   : > { %2748 = vmatmul.msk.f32.vlgmr.msrb.gmra.mxu3 %vm2270_vm9, %v2305_v52 }
 0x6e8   : > { %v2306_v57 = vld [vmem:[#allocation4 + $0x8] sm:$0xff]  ;;  %v2307_v60 = vld [vmem:[#allocation4 + $0x10] sm:$0x3f] }
 0x6e9   : > { %2743 = vmatmul.msk.f32.gmra.mxu0 %vm2270_vm9, %v2306_v57  ;;  %2746 = vmatmul.msk.f32.gmra.mxu1 %vm2270_vm9, %v2306_v57 }
 0x6ea   : > { %2749 = vmatmul.msk.f32.gmra.mxu3 %vm2270_vm9, %v2306_v57 }
 0x6f1   : > { %2744 = vmatmul.msk.f32.gmra.mxu0 %vm2270_vm9, %v2307_v60  ;;  %2747 = vmatmul.msk.f32.gmra.mxu1 %vm2270_vm9, %v2307_v60 }
 0x6f2   : > { %2750 = vmatmul.msk.f32.gmra.mxu3 %vm2270_vm9, %v2307_v60 }
 0x6f9   : > { %2751 = vmatmul.msk.f32.vlgmr.msra.gmra.mxu0 %vm2270_vm9, %v2305_v52  ;;  %v2564_v52 = vld [vmem:[%s4385_s9 + $0x38] sm:$0xff] }
 0x6fa   : > { %2577 = vmatpush.msrb.mxu1 %v2564_v52 }
 0x701   : > { %2752 = vmatmul.msk.f32.gmra.mxu0 %vm2270_vm9, %v2306_v57  ;;  %v2563_v57 = vld [vmem:[%s4385_s9 + $0x30] sm:$0xff] }
 0x702   : > { %2578 = vmatpush.msrb.mxu1 %v2563_v57 }
 0x709   : > { %2753 = vmatmul.msk.f32.gmra.mxu0 %vm2270_vm9, %v2307_v60  ;;  %v2562_v60 = vld [vmem:[%s4385_s9 + $0x28] sm:$0xff] }
 0x70a   : > { %2579 = vmatpush.msrb.mxu1 %v2562_v60 }
 0x75e   : > { %v2351_v0 = vpop.f32.mrf.mxu0  ;;  %v2377_v24 = vpop.f32.mrf.mxu1 }
 0x75f   : > { %v2441_v56 = vrot.slane %v2351_v0, 1  ;;  %v2457_v46 = vrot.slane %v2377_v24, 2  ;;  %v2466_v35 = vrot.slane %v2377_v24, 3  ;;  %v2559_v24 = vld [vmem:[%s4385_s9 + $0x10] sm:$0xff] }
 0x765   : > { %v2403_v36 = vpop.f32.mrf.mxu3 }
 0x766   : > { %v2354_v54 = vpop.f32.mrf.mxu0  ;;  %v2380_v62 = vpop.f32.mrf.mxu1  ;;  %v2482_v42 = vrot.slane %v2403_v36, 4  ;;  %v2491_v28 = vrot.slane %v2403_v36, 5  ;;  %v2558_v36 = vld [vmem:[%s4385_s9 + $0x8] sm:$0xff] }
 0x767   : > { %v2442_v50 = vrot.slane %v2354_v54, 1  ;;  %v2458_v51 = vrot.slane %v2380_v62, 2  ;;  %v2467_v27 = vrot.slane %v2380_v62, 3  ;;  %v2894_v62 = vmov 8.0  }
 0x768   : > { %2816 = vrcp.f32 %v2894_v62 }
 0x769   : > { %v2443_v58 = vsel %vm544_vm2, %v2441_v56, %v2442_v50  ;;  %v2459_v8 = vsel %vm642_vm3, %v2457_v46, %v2458_v51  ;;  %v2468_v32 = vsel %vm740_vm4, %v2466_v35, %v2467_v27  ;;  %v2815_v46 = vld [vmem:[%s4384_s8] ss:$0 sm:$0xff] }
 0x76a   : > { %2446 = vrot.lane.b32.xlu0 %v2443_v58, %s4516_s30 }
 0x76d   : > { %v2406_v17 = vpop.f32.mrf.mxu3 }
 0x76e   : > { %v2483_v7 = vrot.slane %v2406_v17, 4  ;;  %v2357_v29 = vpop.f32.mrf.mxu0  ;;  %v2383_v9 = vpop.f32.mrf.mxu1  ;;  %v2492_v63 = vrot.slane %v2406_v17, 5 }
 0x76f   : > { %v2444_v4 = vrot.slane %v2357_v29, 1  ;;  %v2469_v59 = vrot.slane %v2383_v9, 3  ;;  %v2460_v41 = vrot.slane %v2383_v9, 2  ;;  %v2817_v56 = vpop.eup %2816 }
 0x770   : > { %v2484_v26 = vsel %vm838_vm5, %v2482_v42, %v2483_v7  ;;  %v2493_v47 = vsel %vm936_vm6, %v2491_v28, %v2492_v63 }
 0x771   : > { %v2470_v61 = vsel %vm740_vm4, %v2467_v27, %v2469_v59  ;;  %v2445_v5 = vsel %vm544_vm2, %v2442_v50, %v2444_v4  ;;  %v2461_v55 = vsel %vm642_vm3, %v2458_v51, %v2460_v41  ;;  %v2550_v50 = vmul.f32 8.0, %v2817_v56 }
 0x772   : > { %2473 = vrot.lane.b32.xlu1 %v2470_v61, %s4516_s30  ;;  %2448 = vrot.lane.b32.xlu2 %v2445_v5, %s4516_s30  ;;  %vm2589_vm2 = vcmask 32768  }
 0x773   : > { %v2551_v17 = vsub.f32 1.0, %v2550_v50 }
 0x775   : > { %v2409_v15 = vpop.f32.mrf.mxu3  ;;  %v2552_v29 = vmul.f32 %v2817_v56, %v2551_v17 }
 0x776   : > { %v2485_v23 = vrot.slane %v2409_v15, 4  ;;  %v2494_v38 = vrot.slane %v2409_v15, 5  ;;  %v2429_v48 = vpop.f32.mrf.mxu0  ;;  %v2565_v15 = vld [vmem:[%s4386_s10] sm:$0x1] }
 0x777   : > { %v2507_v25 = vrot.slane %v2429_v48, 6  ;;  %v2553_v4 = vadd.f32 %v2817_v56, %v2552_v29 }
 0x778   : > { %v2495_v22 = vsel %vm936_vm6, %v2492_v63, %v2494_v38  ;;  %v2486_v11 = vsel %vm838_vm5, %v2483_v7, %v2485_v23 }
 0x779   : > { %2498 = vrot.lane.b32.xlu0 %v2495_v22, %s4516_s30 }
 0x77a   : > { %2496 = vrot.lane.b32.xlu1 %v2493_v47, %s4516_s30  ;;  %2471 = vrot.lane.b32.xlu2 %v2468_v32, %s4516_s30 }
 0x77e   : > { %v2432_v2 = vpop.f32.mrf.mxu0 }
 0x77f   : > { %v2508_v13 = vrot.slane %v2432_v2, 6 }
 0x781   : > { %v2509_v1 = vsel %vm455_vm0, %v2507_v25, %v2508_v13 }
 0x786   : > { %v2435_v31 = vpop.f32.mrf.mxu0 }
 0x787   : > { %v2510_v33 = vrot.slane %v2435_v31, 6 }
 0x789   : > { %v2511_v45 = vsel %vm455_vm0, %v2508_v13, %v2510_v33  ;;  %vm2554_vm0 = vweird.f32 %v2817_v56 }
 0x78a   : > { %v2555_v61 = vsel %vm2554_vm0, %v2817_v56, %v2553_v4 }
 0x7cc   : > { %v2449_v21 = vpop.permute.xlu2 %2448 }
 0x7cd   : > { %v2453_v49 = vadd.f32 %v2449_v21, %v2354_v54  ;;  %v2557_v54 = vld [vmem:[%s4385_s9] sm:$0xff] }
 0x7cf   : > { %v2465_v44 = vadd.f32 %v2461_v55, %v2453_v49 }
 0x7d4   : > { %v2472_v14 = vpop.permute.xlu2 %2471 }
 0x7dc   : > { %v2447_v16 = vpop.permute.xlu0 %2446 }
 0x7dd   : > { %v2452_v30 = vadd.f32 %v2447_v16, %v2351_v0  ;;  %v2561_v0 = vld [vmem:[%s4385_s9 + $0x20] sm:$0xff] }
 0x7de   : > { %2580 = vmatpush.msrb.mxu1 %v2561_v0 }
 0x7df   : > { %v2464_v34 = vadd.f32 %v2459_v8, %v2452_v30 }
 0x7e1   : > { %v2477_v12 = vadd.f32 %v2472_v14, %v2464_v34 }
 0x7e3   : > { %v2489_v3 = vadd.f32 %v2484_v26, %v2477_v12 }
 0x7e4   : > { %v2474_v19 = vpop.permute.xlu1 %2473 }
 0x7e5   : > { %v2478_v6 = vadd.f32 %v2474_v19, %v2465_v44 }
 0x7e7   : > { %v2490_v40 = vadd.f32 %v2486_v11, %v2478_v6 }
 0x7eb   : > { %v2499_v10 = vpop.permute.xlu0 %2498 }
 0x7ec   : > { %v2503_v39 = vadd.f32 %v2499_v10, %v2490_v40  ;;  %v2497_v43 = vpop.permute.xlu1 %2496 }
 0x7ed   : > { %v2502_v18 = vadd.f32 %v2497_v43, %v2489_v3 }
 0x7ee   : > { %v2515_v37 = vadd.f32 %v2511_v45, %v2503_v39 }
 0x7ef   : > { %v2514_v20 = vadd.f32 %v2509_v1, %v2502_v18 }
 0x7f0   : > { %2535 = vmatpush.msra.mxu2 %v2515_v37 }
 0x7f2   : > { %2536 = vmatpush.msra.mxu2 %v2514_v20 }
 0x7f3   : > { %2754 = vmatmul.msk.f32.vlgmr.msra.gmra.mxu2 %vm1893_vm8, %v4003_v53  ;;  %v2560_v53 = vld [vmem:[%s4385_s9 + $0x18] sm:$0xff] }
 0x7f4   : > { %2581 = vmatpush.msrb.mxu1 %v2560_v53 }
 0x7f6   : > { %2582 = vmatpush.msrb.mxu1 %v2559_v24 }
 0x7f8   : > { %2583 = vmatpush.msrb.mxu1 %v2558_v36 }
 0x7fa   : > { %2584 = vmatpush.msrb.mxu1 %v2557_v54 }
 0x876   : > { %v2538_v51 = vpop.f32.mrf.mxu2 }
 0x877   : > { %v2539_v58 = vadd.f32 %v2815_v46, %v2538_v51 }
 0x879   : > { %v2541_v8 = vmax.f32 %v2539_v58, 0.0 }
 0x87b   : > { %v2542_v42 = vsel %vm1844_vm12, %v2541_v8, 0.0 }
 0x87c   : > { %v2543_v7 = vrot.slane %v2542_v42, 4 }
 0x87e   : > { %v2544_v9 = vadd.f32 %v2543_v7, %v2542_v42 }
 0x880   : > { %v2545_v27 = vrot.slane %v2544_v9, 2 }
 0x882   : > { %v2546_v59 = vadd.f32 %v2545_v27, %v2544_v9 }
 0x884   : > { %v2547_v26 = vrot.slane %v2546_v59, 1 }
 0x886   : > { %v2548_v5 = vadd.f32 %v2547_v26, %v2546_v59 }
 0x888   : > { %v2556_v63 = vmul.f32 %v2555_v61, %v2548_v5 }
 0x88a   : > { %2755 = vmatmul.msk.f32.vlgmr.msrb.gmra.mxu1 %vm1844_vm12, %v2556_v63 }
 0x907   : > { %v2586_v23 = vpop.f32.mrf.mxu1 }
 0x908   : > { %v2587_v38 = vadd.f32 %v2586_v23, %v2565_v15 }
 0x90a   : > { %2590 = vst.msk [vmem:[%s378_s16] sm:$0x1] %vm2589_vm2, %v2587_v38 }
 0x90b   : > { %2845 = shalt.err (!%p2842_p3)
}
 0x90c   : > { %2760 = dma.vmem_to_hbm [thread:$0]  (%p2993_p5), %s2603_s22, 16, %s2605_s29, %s2592_s13  }
 0x90d PF: > { %p2766_p4 = scmp.ge.s32.totalorder %s2880_s20, 2  ;;  %s2616_s14 = sand.u32 1, %s2868_s17  }
 0x90e   : > { %s2617_s0 = scalar_lea.sflag [#allocation6], %s2616_s14 }
 0x90f   : > { %p2763_p7 = pnand %p2766_p4, %p2997_p6 }
 0x911   : > { %p2764_p8 = pneg %p2763_p7 }
 0x913   : > { %2863 = dma.done.wait (%p2764_p8), %s2617_s0, 16  }
 0x914   : > { %2865 = vsyncadd (%p2764_p8), %s2617_s0, 4294967280  ;;  %p21_p9 = scmp.ge.s32.totalorder %s2980_s23, 4   ;;  %s4518_s17 = smov %s2872_s18 }
 0x915   : > { %s4519_s18 = smov %s2876_s19  ;;  %s4520_s19 = smov %s2991_s26 }
 0x916   : > { %s4521_s20 = smov %s2980_s23  ;;  %23 = sbr.rel (!%p21_p9) target bundleno = 6 (0x6), region = 99 }
 0x91b   :  { %2622 = vsyncpa [#allocation6], 1 }
 0x91c   :  { %2624 = vsyncpa [#allocation6 + $0x1], 1 }

</bundles_post_ra>
